<compile_context>
chip_gen: v7x
topology: tpu7x:2x2x1
jax: 0.10.0
libtpu: 0.0.40
codegen_flags: <defaults>
</compile_context>

<pallas_src>
import jax
import jax.numpy as jnp
from jax import lax
from jax.experimental import pallas as pl
from jax.experimental.pallas import tpu as pltpu

ENC_IN = 332        # observation features
HID1 = 1000         # down_sampler hidden (logical)
HID1P = 1024        # padded (MXU-aligned)
ENC = 300           # encoding_size (logical)
ENCP = 384          # padded (MXU-aligned)
LAT = 100           # policy_latent_size
NACT = 6 + 32       # 38 raw logits
NEXP = 6 + 32 * 2   # 70 expanded logits after repeat_interleave
NEG_BIG = -20000000000.0

HPAD = 128          # padded hidden / per-gate lane width
HEADW = 128         # fused policy(0:100) + value(100) head width
NPAD = 128          # padded expanded-logits width

MAX_TILE_SINGLE_TC = 512   # v5e/v6e: amortize ~0.35us per-grid-step overhead
MAX_TILE_MULTI_TC = 256    # v7x: smaller tiles so the parallel batch axis spans both TCs
_TILE_ALIGN = 32           # second-minor block alignment valid for f32/bf16/int8 inputs

_vmem_spec = pl.BlockSpec(memory_space=pltpu.MemorySpace.VMEM)


def _num_tensorcores():
    # v7x has 2 TensorCores per chip; v5e/v6e have 1.
    try:
        kind = jax.devices()[0].device_kind.lower()
    except Exception:
        return 1
    return 2 if "v7" in kind else 1


def _round_up(x, m):
    return ((x + m - 1) // m) * m


def _batch_tile(B):
    ntc = _num_tensorcores()
    if ntc > 1 and B > _TILE_ALIGN:
        # ensure >= ntc grid steps so both TensorCores get work
        tb = min(MAX_TILE_MULTI_TC, _round_up(pl.cdiv(B, ntc), _TILE_ALIGN))
    else:
        tb = min(MAX_TILE_SINGLE_TC, B)
    if tb >= B:
        return B, (1,)
    tb = max(_TILE_ALIGN, (tb // _TILE_ALIGN) * _TILE_ALIGN)
    return tb, (pl.cdiv(B, tb),)


# ---------------------------------------------------------------------------
# step 0: forward_initial  (down_sampler -> fused policy/value head)
# ---------------------------------------------------------------------------
def _initial_kernel(obs_ref, w1_ref, b1_ref, w2_ref, b2_ref, wh_ref, bh_ref, out_ref):
    x = obs_ref[...].astype(jnp.bfloat16)
    h1 = jnp.dot(x, w1_ref[...], preferred_element_type=jnp.float32) + b1_ref[...]
    h1 = jnp.maximum(h1, 0.0)                                   # [tb, 1024]
    enc = jnp.dot(h1.astype(jnp.bfloat16), w2_ref[...],
                  preferred_element_type=jnp.float32) + b2_ref[...]
    enc = jnp.maximum(enc, 0.0)                                 # [tb, 384]
    head = jnp.dot(enc.astype(jnp.bfloat16), wh_ref[...],
                   preferred_element_type=jnp.float32) + bh_ref[...]
    # lanes [0,LAT) = policy (ReLU), lane LAT = value (tanh), rest = zero padding
    lane = lax.broadcasted_iota(jnp.int32, head.shape, 1)
    out_ref[...] = jnp.where(lane < LAT, jnp.maximum(head, 0.0), jnp.tanh(head))


def forward_initial(params, observation):
    B = observation.shape[0]
    tb, grid = _batch_tile(B)
    out = pl.pallas_call(
        _initial_kernel,
        grid=grid,
        in_specs=[
            pl.BlockSpec((tb, ENC_IN), lambda i: (i, 0)),
            _vmem_spec, _vmem_spec, _vmem_spec, _vmem_spec, _vmem_spec, _vmem_spec,
        ],
        out_specs=pl.BlockSpec((tb, HEADW), lambda i: (i, 0)),
        out_shape=jax.ShapeDtypeStruct((B, HEADW), jnp.float32),
        compiler_params=pltpu.CompilerParams(dimension_semantics=("parallel",)),
    )(observation,
      params["ds_w1"], params["ds_b1"],
      params["ds_w2"], params["ds_b2"],
      params["head_w"], params["head_b"])
    policy_distribution = out[:, :LAT]
    state_vals = out[:, LAT:LAT + 1]
    return policy_distribution, state_vals


# ---------------------------------------------------------------------------
# step 1: forward_communicate (single-layer GRU, batch_first, return h_T)
# ---------------------------------------------------------------------------
def _gru_kernel(x_ref, h0_ref, wih_ref, whh_ref, bih_ref, bhhn_ref, hn_ref):
    T = x_ref.shape[1] // LAT

    wih = wih_ref[...]
    whh = whh_ref[...]
    bih = bih_ref[...]      # input bias with b_hr, b_hz folded in
    bhhn = bhhn_ref[...]    # hidden bias of the n gate only

    # lane-pad h0 (100 -> 128) on-chip (no wrapper-side HBM pad pass);
    # the output block doubles as the staging buffer.
    hn_ref[...] = jnp.zeros_like(hn_ref)
    hn_ref[:, :LAT] = h0_ref[...]
    h = hn_ref[...]

    # TODO(synk): evaluate pltpu.matmul_push_rhs to keep Whh resident across timesteps.
    # T is static -> fully unrolled.  Each timestep's input-gate matmul depends only
    # on x, so the scheduler overlaps it with the serial h@Whh + gate-math chain.
    for t in range(T):
        xt = x_ref[:, t * LAT:(t + 1) * LAT]                   # [tb, 100] static lane slice
        gi = jnp.dot(xt.astype(jnp.bfloat16), wih,
                     preferred_element_type=jnp.float32) + bih
        gh = jnp.dot(h.astype(jnp.bfloat16), whh,
                     preferred_element_type=jnp.float32)
        # sigmoid(x) == 0.5*tanh(x/2) + 0.5 : one EUP pass per gate (vs exp + recip)
        r = 0.5 * jnp.tanh(0.5 * (gi[:, 0:HPAD] + gh[:, 0:HPAD])) + 0.5
        z = 0.5 * jnp.tanh(0.5 * (gi[:, HPAD:2 * HPAD] + gh[:, HPAD:2 * HPAD])) + 0.5
        n = jnp.tanh(gi[:, 2 * HPAD:3 * HPAD] + r * (gh[:, 2 * HPAD:3 * HPAD] + bhhn))
        h = (1.0 - z) * n + z * h
    hn_ref[...] = h


def forward_communicate(params, policy_dist, neighbors):
    # neighbors: [B, T, LAT] batch-first (same as the PyTorch GRU).
    B, T = neighbors.shape[0], neighbors.shape[1]
    # [B, T, LAT] -> [B, T*LAT] is a free (contiguous) reshape: no transpose, no HBM pass.
    x2 = neighbors.reshape(B, T * LAT)

    tb, grid = _batch_tile(B)
    # keep the double-buffered input block ~<= 8 MiB so long sequences stay inside the
    # default scoped-VMEM budget (v7x: 64 MiB physical / 32 MiB scoped).
    max_tb = max(_TILE_ALIGN,
                 ((8 * 1024 * 1024) // (2 * T * LAT * 4)) // _TILE_ALIGN * _TILE_ALIGN)
    if tb > max_tb:
        tb = max_tb
        grid = (pl.cdiv(B, tb),)

    hn = pl.pallas_call(
        _gru_kernel,
        grid=grid,
        in_specs=[
            pl.BlockSpec((tb, T * LAT), lambda i: (i, 0)),
            pl.BlockSpec((tb, LAT), lambda i: (i, 0)),
            _vmem_spec, _vmem_spec, _vmem_spec, _vmem_spec,
        ],
        out_specs=pl.BlockSpec((tb, HPAD), lambda i: (i, 0)),
        out_shape=jax.ShapeDtypeStruct((B, HPAD), jnp.float32),
        compiler_params=pltpu.CompilerParams(dimension_semantics=("parallel",)),
    )(x2, policy_dist,
      params["gru_wih"], params["gru_whh"],
      params["gru_bih"], params["gru_bhh_n"])
    return hn[:, :LAT]


# ---------------------------------------------------------------------------
# step 2: forward_probs (expansion matrix folded into logit weights)
# ---------------------------------------------------------------------------
def _probs_kernel(lat_ref, wl_ref, bl_ref, avail_ref, out_ref):
    logits = (jnp.dot(lat_ref[...].astype(jnp.bfloat16), wl_ref[...],
                      preferred_element_type=jnp.float32) + bl_ref[...])   # [tb, 128]
    lane = lax.broadcasted_iota(jnp.int32, logits.shape, 1)
    # real-but-unavailable lanes -> NEG_BIG (matches PyTorch masked_fill);
    # padding lanes (>= NEXP) -> -inf so they contribute exactly 0 to the softmax.
    neg = jnp.where(lane < NEXP, NEG_BIG, -jnp.inf)
    masked = jnp.where(avail_ref[...] > 0, logits, neg)
    m = jnp.max(masked, axis=-1, keepdims=True)
    ex = jnp.exp(masked - m)
    s = jnp.sum(ex, axis=-1, keepdims=True)
    out_ref[...] = ex / s          # exact normalization for downstream samplers


def forward_probs(params, latent_vector, available_actions):
    B = latent_vector.shape[0]
    # int8 mask (4x smaller DMA than f32); pad lanes are 0 == "unavailable"
    avail = jnp.pad(available_actions.astype(jnp.int8), ((0, 0), (0, NPAD - NEXP)))
    tb, grid = _batch_tile(B)
    probs = pl.pallas_call(
        _probs_kernel,
        grid=grid,
        in_specs=[
            pl.BlockSpec((tb, LAT), lambda i: (i, 0)),
            _vmem_spec, _vmem_spec,
            pl.BlockSpec((tb, NPAD), lambda i: (i, 0)),
        ],
        out_specs=pl.BlockSpec((tb, NPAD), lambda i: (i, 0)),
        out_shape=jax.ShapeDtypeStruct((B, NPAD), jnp.float32),
        compiler_params=pltpu.CompilerParams(dimension_semantics=("parallel",)),
    )(latent_vector, params["logit_w"], params["logit_b"], avail)
    return probs[:, :NEXP]


# ---------------------------------------------------------------------------
# dispatch, mirroring Colossi.forward(observation, step, neighbors)
# ---------------------------------------------------------------------------
def colossi_forward(params, observation, step, neighbors=None):
    if step == 0:
        return forward_initial(params, observation)
    elif step == 1:
        return forward_communicate(params, observation, neighbors)
    elif step == 2:
        return forward_probs(params, observation, neighbors)
    else:
        raise Exception("Incorrect step number for forward prop, should be: 0,1,2")


# ---------------------------------------------------------------------------
# deterministic parameter construction (mimics init_params + PyTorch defaults),
# stored in the kernel-friendly (padded / folded / bf16) layouts.
# ---------------------------------------------------------------------------
def _normed_linear(key, in_f, out_f):
    # PyTorch init_params: weight ~ N(0,1), each output row normalized to unit L2;
    # bias = 0. Returned transposed [in, out]; bias as [1, out] (f32).
    w = jax.random.normal(key, (out_f, in_f), jnp.float32)
    w = w / jnp.sqrt(jnp.sum(w * w, axis=1, keepdims=True))
    return w.T, jnp.zeros((1, out_f), jnp.float32)


def _expansion_matrix():
    # column k of the expanded logits copies source logit: k for k<6, else 6+(k-6)//2
    cols = jnp.arange(NEXP)
    src = jnp.where(cols < 6, cols, 6 + (cols - 6) // 2)
    return (jnp.arange(NACT)[:, None] == src[None, :]).astype(jnp.float32)  # [38, 70]


def _pad2(a, rows, cols):
    return jnp.pad(a, ((0, rows - a.shape[0]), (0, cols - a.shape[1])))


def _pad_gates(w, rows):
    # [in, 3*LAT] (gate order r,z,n) -> [rows, 3*HPAD] with each gate at a 128-lane offset
    out = jnp.zeros((rows, 3 * HPAD), jnp.float32)
    for g in range(3):
        out = out.at[:w.shape[0], g * HPAD:g * HPAD + LAT].set(w[:, g * LAT:(g + 1) * LAT])
    return out


def make_params(key):
    ks = jax.random.split(key, 9)
    p = {}

    w1, b1 = _normed_linear(ks[0], ENC_IN, HID1)   # [332, 1000]
    w2, b2 = _normed_linear(ks[1], HID1, ENC)      # [1000, 300]
    wp, bp = _normed_linear(ks[2], ENC, LAT)
    wv, bv = _normed_linear(ks[3], ENC, 1)
    wl, bl = _normed_linear(ks[4], LAT, NACT)

    # --- down sampler, MXU-aligned: 1000 -> 1024 and 300 -> 384 (zero padding) ---
    p["ds_w1"] = _pad2(w1, ENC_IN, HID1P).astype(jnp.bfloat16)   # [332, 1024]
    p["ds_b1"] = _pad2(b1, 1, HID1P)                             # [1, 1024]
    p["ds_w2"] = _pad2(w2, HID1P, ENCP).astype(jnp.bfloat16)     # [1024, 384]
    p["ds_b2"] = _pad2(b2, 1, ENCP)                              # [1, 384]

    # --- fused policy+value head, 128-lane output, ENCP rows ---
    wh = jnp.zeros((ENCP, HEADW), jnp.float32)
    wh = wh.at[:ENC, :LAT].set(wp).at[:ENC, LAT:LAT + 1].set(wv)
    bh = jnp.zeros((1, HEADW), jnp.float32)
    bh = bh.at[:, :LAT].set(bp[0]).at[:, LAT:LAT + 1].set(bv[0])
    p["head_w"] = wh.astype(jnp.bfloat16)
    p["head_b"] = bh

    # --- expansion matrix folded into logit weights, padded to 128 lanes ---
    E = _expansion_matrix()
    p["logit_w"] = _pad2(wl @ E, LAT, NPAD).astype(jnp.bfloat16)   # [100, 128]
    p["logit_b"] = _pad2(bl @ E, 1, NPAD)                          # [1, 128]

    # --- GRU params: PyTorch default uniform(-k, k), k = 1/sqrt(hidden). Gates r,z,n,
    #     lane-aligned at 128-lane offsets; b_hr/b_hz folded into the input bias. ---
    k = 1.0 / jnp.sqrt(jnp.float32(LAT))
    wih = jax.random.uniform(ks[5], (LAT, 3 * LAT), jnp.float32, -k, k)
    whh = jax.random.uniform(ks[6], (LAT, 3 * LAT), jnp.float32, -k, k)
    bih = jax.random.uniform(ks[7], (1, 3 * LAT), jnp.float32, -k, k)
    bhh = jax.random.uniform(ks[8], (1, 3 * LAT), jnp.float32, -k, k)

    bih_p = _pad_gates(bih, 1)                                    # [1, 384]
    bhh_p = _pad_gates(bhh, 1)                                    # [1, 384]
    bih_fused = bih_p.at[:, :2 * HPAD].add(bhh_p[:, :2 * HPAD])   # fold b_hr, b_hz

    p["gru_wih"] = _pad_gates(wih, LAT).astype(jnp.bfloat16)      # [100, 384]
    p["gru_whh"] = _pad_gates(whh, HPAD).astype(jnp.bfloat16)     # [128, 384], rows 100:128 zero
    p["gru_bih"] = bih_fused                                      # [1, 384] f32
    p["gru_bhh_n"] = bhh_p[:, 2 * HPAD:]                          # [1, 128] f32 (n gate only)
    return p


# ---------------------------------------------------------------------------
# pure-JAX reference (same stored params / dtypes) for a sanity check
# ---------------------------------------------------------------------------
def _reference(params, observation, neighbors, available_actions):
    bf = jnp.bfloat16
    h1 = jnp.maximum(jnp.dot(observation.astype(bf), params["ds_w1"],
                             preferred_element_type=jnp.float32) + params["ds_b1"], 0.0)
    enc = jnp.maximum(jnp.dot(h1.astype(bf), params["ds_w2"],
                              preferred_element_type=jnp.float32) + params["ds_b2"], 0.0)
    head = jnp.dot(enc.astype(bf), params["head_w"],
                   preferred_element_type=jnp.float32) + params["head_b"]
    pol = jnp.maximum(head[:, :LAT], 0.0)
    val = jnp.tanh(head[:, LAT:LAT + 1])

    h = jnp.pad(pol, ((0, 0), (0, HPAD - LAT)))
    for t in range(neighbors.shape[1]):
        gi = jnp.dot(neighbors[:, t, :].astype(bf), params["gru_wih"],
                     preferred_element_type=jnp.float32) + params["gru_bih"]
        gh = jnp.dot(h.astype(bf), params["gru_whh"],
                     preferred_element_type=jnp.float32)
        r = jax.nn.sigmoid(gi[:, :HPAD] + gh[:, :HPAD])
        z = jax.nn.sigmoid(gi[:, HPAD:2 * HPAD] + gh[:, HPAD:2 * HPAD])
        n = jnp.tanh(gi[:, 2 * HPAD:] + r * (gh[:, 2 * HPAD:] + params["gru_bhh_n"]))
        h = (1.0 - z) * n + z * h
    lat = h[:, :LAT]

    logits = (jnp.dot(lat.astype(bf), params["logit_w"],
                      preferred_element_type=jnp.float32) + params["logit_b"])[:, :NEXP]
    masked = jnp.where(available_actions, logits, NEG_BIG)
    ex = jnp.exp(masked - jnp.max(masked, axis=-1, keepdims=True))
    probs = ex / jnp.sum(ex, axis=-1, keepdims=True)
    return pol, val, lat, probs


if __name__ == "__main__":
    key = jax.random.PRNGKey(0)
    kp, ko, kn, ka = jax.random.split(key, 4)

    params = make_params(kp)

    B = 2
    NUM_NEIGHBORS = 4

    # step 0: raw observation [B, 332]
    observation = jax.random.normal(ko, (B, ENC_IN), jnp.float32)
    policy_dist, state_vals = colossi_forward(params, observation, step=0)

    # step 1: communicate with neighbor latent distributions [B, N, 100] (batch_first)
    neighbors = jax.random.normal(kn, (B, NUM_NEIGHBORS, LAT), jnp.float32)
    latent = colossi_forward(params, policy_dist, step=1, neighbors=neighbors)

    # step 2: action probabilities with availability mask [B, 70] (bool)
    available_actions = jax.random.bernoulli(ka, 0.7, (B, NEXP))
    available_actions = available_actions.at[:, 0].set(True)
    probs = colossi_forward(params, latent, step=2, neighbors=available_actions)

    jax.block_until_ready((policy_dist, state_vals, latent, probs))

    assert policy_dist.shape == (B, LAT)
    assert state_vals.shape == (B, 1)
    assert latent.shape == (B, LAT)
    assert probs.shape == (B, NEXP)

    # numerical sanity check vs pure-JAX reference using the same params
    ref_pol, ref_val, ref_lat, ref_probs = _reference(
        params, observation, neighbors, available_actions)
    assert bool(jnp.allclose(policy_dist, ref_pol, atol=2e-2, rtol=2e-2))
    assert bool(jnp.allclose(state_vals, ref_val, atol=2e-2, rtol=2e-2))
    assert bool(jnp.allclose(latent, ref_lat, atol=2e-2, rtol=2e-2))
    assert bool(jnp.allclose(probs, ref_probs, atol=2e-2, rtol=2e-2))
    assert bool(jnp.allclose(jnp.sum(probs, axis=-1), 1.0, atol=1e-3))

    print("KERNEL_OK")
</pallas_src>

<mosaic_0001>
module attributes {stable_mosaic.version = 11 : i64} {
  func.func @_initial_kernel(%arg0: i32, %arg1: memref<2x332xf32, #tpu.memory_space<vmem>>, %arg2: memref<332x1024xbf16, #tpu.memory_space<vmem>>, %arg3: memref<1x1024xf32, #tpu.memory_space<vmem>>, %arg4: memref<1024x384xbf16, #tpu.memory_space<vmem>>, %arg5: memref<1x384xf32, #tpu.memory_space<vmem>>, %arg6: memref<384x128xbf16, #tpu.memory_space<vmem>>, %arg7: memref<1x128xf32, #tpu.memory_space<vmem>>, %arg8: memref<2x128xf32, #tpu.memory_space<vmem>>) attributes {dimension_semantics = [#tpu.dimension_semantics<parallel>], iteration_bounds = array<i64: 1>, scalar_prefetch = 0 : i64, scratch_operands = 0 : i64, tpu.core_type = #tpu.core_type<tc>, window_params = [{transform_indices = @transform_0, window_bounds = array<i64: 2, 332>}, {pipeline_mode = #tpu.pipeline_mode<synchronous>, transform_indices = @transform_1, window_bounds = array<i64: 332, 1024>}, {pipeline_mode = #tpu.pipeline_mode<synchronous>, transform_indices = @transform_2, window_bounds = array<i64: 1, 1024>}, {pipeline_mode = #tpu.pipeline_mode<synchronous>, transform_indices = @transform_3, window_bounds = array<i64: 1024, 384>}, {pipeline_mode = #tpu.pipeline_mode<synchronous>, transform_indices = @transform_4, window_bounds = array<i64: 1, 384>}, {pipeline_mode = #tpu.pipeline_mode<synchronous>, transform_indices = @transform_5, window_bounds = array<i64: 384, 128>}, {pipeline_mode = #tpu.pipeline_mode<synchronous>, transform_indices = @transform_6, window_bounds = array<i64: 1, 128>}, {transform_indices = @transform_7, window_bounds = array<i64: 2, 128>}]} {
    %c0 = arith.constant 0 : index
    %c0_0 = arith.constant 0 : index
    %0 = vector.load %arg1[%c0, %c0_0] : memref<2x332xf32, #tpu.memory_space<vmem>>, vector<2x332xf32>
    %1 = arith.truncf %0 : vector<2x332xf32> to vector<2x332xbf16>
    %c0_1 = arith.constant 0 : index
    %c0_2 = arith.constant 0 : index
    %2 = vector.load %arg2[%c0_1, %c0_2] : memref<332x1024xbf16, #tpu.memory_space<vmem>>, vector<332x1024xbf16>
    %cst = arith.constant dense<0.000000e+00> : vector<2x1024xf32>
    %3 = tpu.matmul %1, %2, %cst {dimension_numbers = #tpu.dot_dimension_numbers<[1], [0], [0], [1], [0, 0, 1, 1], [], []>} : vector<2x332xbf16>, vector<332x1024xbf16>, vector<2x1024xf32> -> vector<2x1024xf32>
    %c0_3 = arith.constant 0 : index
    %c0_4 = arith.constant 0 : index
    %4 = vector.load %arg3[%c0_3, %c0_4] : memref<1x1024xf32, #tpu.memory_space<vmem>>, vector<1x1024xf32>
    %5 = vector.broadcast %4 : vector<1x1024xf32> to vector<2x1024xf32>
    %6 = arith.addf %3, %5 : vector<2x1024xf32>
    %cst_5 = arith.constant 0.000000e+00 : f32
    %7 = vector.broadcast %cst_5 : f32 to vector<2x1024xf32>
    %8 = arith.maximumf %6, %7 : vector<2x1024xf32>
    %9 = arith.truncf %8 : vector<2x1024xf32> to vector<2x1024xbf16>
    %c0_6 = arith.constant 0 : index
    %c0_7 = arith.constant 0 : index
    %10 = vector.load %arg4[%c0_6, %c0_7] : memref<1024x384xbf16, #tpu.memory_space<vmem>>, vector<1024x384xbf16>
    %cst_8 = arith.constant dense<0.000000e+00> : vector<2x384xf32>
    %11 = tpu.matmul %9, %10, %cst_8 {dimension_numbers = #tpu.dot_dimension_numbers<[1], [0], [0], [1], [0, 0, 1, 1], [], []>} : vector<2x1024xbf16>, vector<1024x384xbf16>, vector<2x384xf32> -> vector<2x384xf32>
    %c0_9 = arith.constant 0 : index
    %c0_10 = arith.constant 0 : index
    %12 = vector.load %arg5[%c0_9, %c0_10] : memref<1x384xf32, #tpu.memory_space<vmem>>, vector<1x384xf32>
    %13 = vector.broadcast %12 : vector<1x384xf32> to vector<2x384xf32>
    %14 = arith.addf %11, %13 : vector<2x384xf32>
    %cst_11 = arith.constant 0.000000e+00 : f32
    %15 = vector.broadcast %cst_11 : f32 to vector<2x384xf32>
    %16 = arith.maximumf %14, %15 : vector<2x384xf32>
    %17 = arith.truncf %16 : vector<2x384xf32> to vector<2x384xbf16>
    %c0_12 = arith.constant 0 : index
    %c0_13 = arith.constant 0 : index
    %18 = vector.load %arg6[%c0_12, %c0_13] : memref<384x128xbf16, #tpu.memory_space<vmem>>, vector<384x128xbf16>
    %cst_14 = arith.constant dense<0.000000e+00> : vector<2x128xf32>
    %19 = tpu.matmul %17, %18, %cst_14 {dimension_numbers = #tpu.dot_dimension_numbers<[1], [0], [0], [1], [0, 0, 1, 1], [], []>} : vector<2x384xbf16>, vector<384x128xbf16>, vector<2x128xf32> -> vector<2x128xf32>
    %c0_15 = arith.constant 0 : index
    %c0_16 = arith.constant 0 : index
    %20 = vector.load %arg7[%c0_15, %c0_16] : memref<1x128xf32, #tpu.memory_space<vmem>>, vector<1x128xf32>
    %21 = vector.broadcast %20 : vector<1x128xf32> to vector<2x128xf32>
    %22 = arith.addf %19, %21 : vector<2x128xf32>
    %23 = tpu.iota {dimensions = array<i32: 1>} : vector<2x128xi32>
    %c100_i32 = arith.constant 100 : i32
    %24 = vector.broadcast %c100_i32 : i32 to vector<2x128xi32>
    %25 = arith.cmpi slt, %23, %24 : vector<2x128xi32>
    %cst_17 = arith.constant 0.000000e+00 : f32
    %26 = vector.broadcast %cst_17 : f32 to vector<2x128xf32>
    %27 = arith.maximumf %22, %26 : vector<2x128xf32>
    %28 = math.tanh %22 : vector<2x128xf32>
    %29 = arith.select %25, %27, %28 : vector<2x128xi1>, vector<2x128xf32>
    %c0_18 = arith.constant 0 : index
    %c0_19 = arith.constant 0 : index
    %30 = vector.load %arg8[%c0_18, %c0_19] : memref<2x128xf32, #tpu.memory_space<vmem>>, vector<2x128xf32>
    tpu.vector_store %arg8[%c0_18, %c0_19], %29 {strides = array<i32>} : memref<2x128xf32, #tpu.memory_space<vmem>>, vector<2x128xf32>,
    return
  }
  func.func @transform_0(%arg0: i32) -> (i32, i32) {
    %c0_i32 = arith.constant 0 : i32
    %c0_i32_0 = arith.constant 0 : i32
    return %arg0, %c0_i32 : i32, i32
  }
  func.func @transform_1(%arg0: i32) -> (i32, i32) {
    %c0_i32 = arith.constant 0 : i32
    %c0_i32_0 = arith.constant 0 : i32
    %c0_i32_1 = arith.constant 0 : i32
    return %c0_i32, %c0_i32_0 : i32, i32
  }
  func.func @transform_2(%arg0: i32) -> (i32, i32) {
    %c0_i32 = arith.constant 0 : i32
    %c0_i32_0 = arith.constant 0 : i32
    %c0_i32_1 = arith.constant 0 : i32
    return %c0_i32, %c0_i32_0 : i32, i32
  }
  func.func @transform_3(%arg0: i32) -> (i32, i32) {
    %c0_i32 = arith.constant 0 : i32
    %c0_i32_0 = arith.constant 0 : i32
    %c0_i32_1 = arith.constant 0 : i32
    return %c0_i32, %c0_i32_0 : i32, i32
  }
  func.func @transform_4(%arg0: i32) -> (i32, i32) {
    %c0_i32 = arith.constant 0 : i32
    %c0_i32_0 = arith.constant 0 : i32
    %c0_i32_1 = arith.constant 0 : i32
    return %c0_i32, %c0_i32_0 : i32, i32
  }
  func.func @transform_5(%arg0: i32) -> (i32, i32) {
    %c0_i32 = arith.constant 0 : i32
    %c0_i32_0 = arith.constant 0 : i32
    %c0_i32_1 = arith.constant 0 : i32
    return %c0_i32, %c0_i32_0 : i32, i32
  }
  func.func @transform_6(%arg0: i32) -> (i32, i32) {
    %c0_i32 = arith.constant 0 : i32
    %c0_i32_0 = arith.constant 0 : i32
    %c0_i32_1 = arith.constant 0 : i32
    return %c0_i32, %c0_i32_0 : i32, i32
  }
  func.func @transform_7(%arg0: i32) -> (i32, i32) {
    %c0_i32 = arith.constant 0 : i32
    %c0_i32_0 = arith.constant 0 : i32
    return %arg0, %c0_i32 : i32, i32
  }
}

</mosaic_0001>

<bundles_post_ra>
// kernel: tpu_custom_call.1
= control target key start
LH: loop header
LB: loop body
LE: loop exit
PB: predicated region body
PF: predicated region fallthrough
CT: control target
= control target key end

     0   :  { %12 = vsyncpa [#allocation3], 0  ;;  %s4683_s0 = inlined_call_operand.hbm [shape: f32[2,332], index: 0, kind: input, shape index: {}]   ;;  %s4684_s1 = inlined_call_operand.hbm [shape: bf16[332,1024], index: 1, kind: input, shape index: {}]   ;;  %s4685_s2 = inlined_call_operand.hbm [shape: f32[1,1024], index: 2, kind: input, shape index: {}]   ;;  %s4686_s3 = inlined_call_operand.hbm [shape: bf16[1024,384], index: 3, kind: input, shape index: {}]   ;;  %s4687_s4 = inlined_call_operand.vmem [shape: f32[1,384], index: 4, kind: input, shape index: {}]   ;;  %s4688_s5 = inlined_call_operand.hbm [shape: bf16[384,128], index: 5, kind: input, shape index: {}]   ;;  %s4689_s6 = inlined_call_operand.vmem [shape: f32[1,128], index: 6, kind: input, shape index: {}]   ;;  %s4690_s7 = inlined_call_operand.hbm [shape: f32[2,128], index: 7, kind: output, shape index: {}]  }
   0x1   :  { %13 = vsyncpa [#allocation6], 0 }
   0x2   :  { %14 = vsyncpa [#allocation9], 0 }
   0x3   :  { %15 = vsyncpa [#allocation4], 0  ;;  %s4466_s24 = smov [#allocation5]   ;;  %s4326_s28 = scalar_lea.hbm %s4684_s1, 21504 }
   0x4   :  { %s31_s25 = sshll.u32 %s4466_s24, 4  ;;  %p4327_p0 = scmp.ne.s32.totalorder %s4684_s1, %s4326_s28  ;;  %s32_s25 = int_to_ptr.vmem [resolvable:$true] %s31_s25 }
   0x5   :  { %p4330_p1 = scmp.lt.u32.totalorder %s4326_s28, %s4684_s1 }
   0x7   :  { %p4332_p2 = pnand %p4330_p1, %p4327_p0 }
   0x9   :  { %4335 = shalt.err (!%p4332_p2)
}
   0xa   :  { %s4336_s10 = scalar_lea.vmem %s32_s25, 21504  ;;  %p4341_p4 = scmp.lt.s32.totalorder %s32_s25, %s32_s25 }
   0xb   :  { %p4337_p3 = scmp.ne.s32.totalorder %s32_s25, %s4336_s10  ;;  %p4342_p5 = scmp.lt.s32.totalorder %s4336_s10, %s4336_s10 }
   0xd   :  { %p4343_p6 = por %p4342_p5, %p4341_p4 }
   0xf   :  { %p4344_p7 = pnand %p4343_p6, %p4337_p3 }
  0x11   :  { %4347 = shalt.err (!%p4344_p7)
}
  0x12   :  { %s4467_s11 = smov 512   ;;  %s4468_s12 = smov 32  }
  0x13   :  { %37 = dma.hbm_to_vmem [thread:$0]  %s4684_s1, 21504, %s32_s25, [#allocation6], %s4467_s11, %s4467_s11, %s4468_s12  }
  0x14   :  { %s4469_s15 = smov [#allocation8]   ;;  %s4348_s19 = scalar_lea.hbm %s4686_s3, 24576 }
  0x15   :  { %s53_s16 = sshll.u32 %s4469_s15, 4  ;;  %p4349_p8 = scmp.ne.s32.totalorder %s4686_s3, %s4348_s19  ;;  %s54_s16 = int_to_ptr.vmem [resolvable:$true] %s53_s16 }
  0x16   :  { %p4352_p9 = scmp.lt.u32.totalorder %s4348_s19, %s4686_s3 }
  0x18   :  { %p4354_p10 = pnand %p4352_p9, %p4349_p8 }
  0x1a   :  { %4357 = shalt.err (!%p4354_p10)
}
  0x1b   :  { %s4358_s24 = scalar_lea.vmem %s54_s16, 24576  ;;  %p4363_p12 = scmp.lt.s32.totalorder %s54_s16, %s54_s16 }
  0x1c   :  { %p4359_p11 = scmp.ne.s32.totalorder %s54_s16, %s4358_s24  ;;  %p4364_p13 = scmp.lt.s32.totalorder %s4358_s24, %s4358_s24 }
  0x1e   :  { %p4365_p0 = por %p4364_p13, %p4363_p12 }
  0x20   :  { %p4366_p1 = pnand %p4365_p0, %p4359_p11 }
  0x22   :  { %4369 = shalt.err (!%p4366_p1)
}
  0x23   :  { %s4470_s1 = smov 192   ;;  %s4471_s25 = smov 12  }
  0x24   :  { %59 = dma.hbm_to_vmem [thread:$0]  %s4686_s3, 24576, %s54_s16, [#allocation9], %s4470_s1, %s4470_s1, %s4471_s25  }
  0x25   :  { %s4472_s28 = smov [#allocation2]   ;;  %s4473_s30 = smov [#allocation7]  }
  0x26   :  { %s22_s29 = sshll.u32 %s4472_s28, 4  ;;  %s44_s8 = sshll.u32 %s4473_s30, 4  ;;  %s23_s29 = int_to_ptr.vmem [resolvable:$true] %s22_s29  ;;  %s45_s8 = int_to_ptr.vmem [resolvable:$true] %s44_s8 }
  0x27   :  { %s4370_s11 = scalar_lea.hbm %s4683_s0, 96 }
  0x28   :  { %p4371_p2 = scmp.ne.s32.totalorder %s4683_s0, %s4370_s11  ;;  %p4374_p3 = scmp.lt.u32.totalorder %s4370_s11, %s4683_s0 }
  0x2a   :  { %p4376_p4 = pnand %p4374_p3, %p4371_p2 }
  0x2c   :  { %4379 = shalt.err (!%p4376_p4)
}
  0x2d   :  { %s4380_s3 = scalar_lea.vmem %s23_s29, 96  ;;  %p4385_p6 = scmp.lt.s32.totalorder %s23_s29, %s23_s29 }
  0x2e   :  { %p4381_p5 = scmp.ne.s32.totalorder %s23_s29, %s4380_s3  ;;  %p4386_p7 = scmp.lt.s32.totalorder %s4380_s3, %s4380_s3 }
  0x30   :  { %p4387_p8 = por %p4386_p7, %p4385_p6 }
  0x32   :  { %p4388_p9 = pnand %p4387_p8, %p4381_p5 }
  0x34   :  { %4391 = shalt.err (!%p4388_p9)
}
  0x35   :  { %25 = dma.hbm_to_vmem [thread:$0]  %s4683_s0, 96, %s23_s29, [#allocation3]  }
  0x36   :  { %s4392_s20 = scalar_lea.hbm %s4685_s2, 128 }
  0x37   :  { %p4393_p10 = scmp.ne.s32.totalorder %s4685_s2, %s4392_s20  ;;  %p4396_p11 = scmp.lt.u32.totalorder %s4392_s20, %s4685_s2 }
  0x39   :  { %p4398_p12 = pnand %p4396_p11, %p4393_p10 }
  0x3b   :  { %4401 = shalt.err (!%p4398_p12)
}
  0x3c   :  { %s4402_s1 = scalar_lea.vmem %s45_s8, 128  ;;  %p4407_p0 = scmp.lt.s32.totalorder %s45_s8, %s45_s8 }
  0x3d   :  { %p4403_p13 = scmp.ne.s32.totalorder %s45_s8, %s4402_s1  ;;  %p4408_p1 = scmp.lt.s32.totalorder %s4402_s1, %s4402_s1 }
  0x3f   :  { %p4409_p2 = por %p4408_p1, %p4407_p0 }
  0x41   :  { %p4410_p3 = pnand %p4409_p2, %p4403_p13 }
  0x43   :  { %4413 = shalt.err (!%p4410_p3)
}
  0x44   :  { %47 = dma.hbm_to_vmem [thread:$0]  %s4685_s2, 128, %s45_s8, [#allocation6]  }
  0x45   :  { %s4474_s26 = smov [#allocation10]   ;;  %s4414_s30 = scalar_lea.hbm %s4688_s5, 3072 }
  0x46   :  { %s67_s27 = sshll.u32 %s4474_s26, 4  ;;  %p4415_p4 = scmp.ne.s32.totalorder %s4688_s5, %s4414_s30  ;;  %s68_s27 = int_to_ptr.vmem [resolvable:$true] %s67_s27 }
  0x47   :  { %p4418_p5 = scmp.lt.u32.totalorder %s4414_s30, %s4688_s5 }
  0x49   :  { %p4420_p6 = pnand %p4418_p5, %p4415_p4 }
  0x4b   :  { %4423 = shalt.err (!%p4420_p6)
}
  0x4c   :  { %s4424_s13 = scalar_lea.vmem %s68_s27, 3072  ;;  %p4429_p8 = scmp.lt.s32.totalorder %s68_s27, %s68_s27 }
  0x4d   :  { %p4425_p7 = scmp.ne.s32.totalorder %s68_s27, %s4424_s13  ;;  %p4430_p9 = scmp.lt.s32.totalorder %s4424_s13, %s4424_s13 }
  0x4f   :  { %p4431_p10 = por %p4430_p9, %p4429_p8 }
  0x51   :  { %p4432_p11 = pnand %p4431_p10, %p4425_p7 }
  0x53   :  { %4435 = shalt.err (!%p4432_p11)
}
  0x54   :  { %s4475_s2 = smov 64   ;;  %s4476_s8 = smov 4  }
  0x55   :  { %73 = dma.hbm_to_vmem [thread:$0]  %s4688_s5, 3072, %s68_s27, [#allocation9], %s4475_s2, %s4475_s2, %s4476_s8  }
  0x56   :  { %4458 = dma.done.wait [#allocation3], 96  }
  0x57   :  { %4459 = vsyncadd [#allocation3], 4294967200 }
  0x58   :  { %4460 = dma.done.wait [#allocation6], 21632  }
  0x59   :  { %4461 = vsyncadd [#allocation6], 4294945664 }
  0x5a   :  { %4462 = dma.done.wait [#allocation9], 27648  }
  0x5b   :  { %4463 = vsyncadd [#allocation9], 4294939648  ;;  %v4477_v0 = vmov 0   ;;  %v116_v1 = vld [vmem:[#allocation5] sm:$0xff]  ;;  %v4478_v4 = vmov 1983009808   ;;  %v98_v6 = vlaneseq }
  0x5c   :  { %1260 = vmatprep.mubr.bf16.mxu1 %v4477_v0  ;;  %v120_v2 = vld [vmem:[#allocation5 + $0x20] sm:$0xff]  ;;  %v96_v5 = vunpack.c.l.s4 %v4478_v4  ;;  %v92_v36 = vld [vmem:[#allocation2] sm:$0x3f]  ;;  %vm1162_vm0 = vcmask 1045504   ;;  %v117_v52 = vld [vmem:[#allocation5 + $0x8] sm:$0xff]  ;;  %vm1158_vm1 = vcmask 621568  }
  0x5d   :  { %v244_v3 = vld [vmem:[#allocation5 + $0x400] sm:$0xff]  ;;  %v3462_v7 = vcombine.high %v116_v1, %v120_v2  ;;  %v3461_v9 = vcombine.low %v116_v1, %v120_v2  ;;  %v4584_v24 = vshrl.u32 %v98_v6, 7  ;;  %v94_v44 = vcombine.high %v92_v36, %v92_v36  ;;  %v121_v53 = vld [vmem:[#allocation5 + $0x28] sm:$0xff]  ;;  %s4481_s17 = smov [#allocation11]  }
  0x5e   :  { %v248_v8 = vld [vmem:[#allocation5 + $0x420] sm:$0xff]  ;;  %v97_v23 = vunpack.c.0.s8 %v96_v5  ;;  %v3464_v59 = vcombine.high %v117_v52, %v121_v53  ;;  %v125_v62 = vld [vmem:[#allocation5 + $0x48] sm:$0xff]  ;;  %vm4480_vm2 = vmmov 0   ;;  %s3450_s18 = sshll.u32 %s4481_s17, 4  ;;  %s3451_s18 = int_to_ptr.vmem [resolvable:$true] %s3450_s18 }
  0x5f   :  { %v124_v10 = vld [vmem:[#allocation5 + $0x40] sm:$0xff]  ;;  %v3590_v12 = vcombine.high %v244_v3, %v248_v8  ;;  %v3589_v13 = vcombine.low %v244_v3, %v248_v8  ;;  %1187 = vmatprep.subr.bf16.mxu0 %v3462_v7  ;;  %v129_v63 = vld [vmem:[#allocation5 + $0x68] sm:$0xff]  ;;  %v3463_v3 = vcombine.low %v117_v52, %v121_v53  ;;  %s4436_s19 = scalar_lea.vmem %s3451_s18, 32  ;;  %p4441_p13 = scmp.lt.s32.totalorder %s3451_s18, %s3451_s18 }
  0x60   :  { %v128_v11 = vld [vmem:[#allocation5 + $0x60] sm:$0xff]  ;;  %1188 = vmatpush1.bf16.msra.mxu0 %v3461_v9  ;;  %v100_v33 = vsub.s32 %v97_v23, %v4584_v24  ;;  %v3472_v5 = vcombine.high %v125_v62, %v129_v63  ;;  %v133_v9 = vld [vmem:[#allocation5 + $0x88] sm:$0xff]  ;;  %p4437_p12 = scmp.ne.s32.totalorder %s3451_s18, %s4436_s19  ;;  %p4442_p0 = scmp.lt.s32.totalorder %s4436_s19, %s4436_s19 }
  0x61   :  { %v3470_v14 = vcombine.high %v124_v10, %v128_v11  ;;  %v252_v15 = vld [vmem:[#allocation5 + $0x440] sm:$0xff]  ;;  %1228 = vmatprep.subr.bf16.mxu1 %v3590_v12  ;;  %v3469_v22 = vcombine.low %v124_v10, %v128_v11  ;;  %v137_v10 = vld [vmem:[#allocation5 + $0xa8] sm:$0xff]  ;;  %v3471_v12 = vcombine.low %v125_v62, %v129_v63 }
  0x62   :  { %v256_v16 = vld [vmem:[#allocation5 + $0x460] sm:$0xff]  ;;  %1229 = vmatpush1.bf16.msra.mxu1 %v3589_v13  ;;  %v4587_v40 = vrot.slane %v92_v36, %v100_v33  ;;  %v108_v55 = vrot.slane %v94_v44, %v100_v33  ;;  %v169_v44 = vld [vmem:[#allocation5 + $0x1a8] sm:$0xff]  ;;  %p4443_p1 = por %p4442_p0, %p4441_p13 }
  0x63   :  { %v132_v17 = vld [vmem:[#allocation5 + $0x80] sm:$0xff]  ;;  %v3598_v18 = vcombine.high %v252_v15, %v256_v16  ;;  %1189 = vmatprep.subr.bf16.mxu0 %v3470_v14  ;;  %v3597_v25 = vcombine.low %v252_v15, %v256_v16  ;;  %v3480_v14 = vcombine.high %v133_v9, %v137_v10  ;;  %v177_v52 = vld [vmem:[#allocation5 + $0x1e8] sm:$0xff] }
  0x64   :  { %v136_v19 = vld [vmem:[#allocation5 + $0xa0] sm:$0xff]  ;;  %1190 = vmatpush1.bf16.msra.mxu0 %v3469_v22  ;;  %v109_v45 = vcombine.high %v4587_v40, %v4587_v40  ;;  %v4596_v2 = vpack.c.bf16 %v108_v55, %v108_v55  ;;  %p4444_p2 = pnand %p4443_p1, %p4437_p12 }
  0x65   :  { %v260_v20 = vld [vmem:[#allocation5 + $0x480] sm:$0xff]  ;;  %v3478_v26 = vcombine.high %v132_v17, %v136_v19  ;;  %1230 = vmatprep.subr.bf16.mxu1 %v3598_v18  ;;  %v3477_v32 = vcombine.low %v132_v17, %v136_v19  ;;  %v141_v17 = vld [vmem:[#allocation5 + $0xc8] sm:$0xff] }
  0x66   :  { %v264_v21 = vld [vmem:[#allocation5 + $0x4a0] sm:$0xff]  ;;  %1231 = vmatpush1.bf16.msra.mxu1 %v3597_v25  ;;  %v4591_v56 = vpack.c.bf16 %v109_v45, %v109_v45  ;;  %v145_v18 = vld [vmem:[#allocation5 + $0xe8] sm:$0xff] }
  0x67   :  { %v3606_v27 = vcombine.high %v260_v20, %v264_v21  ;;  %v140_v28 = vld [vmem:[#allocation5 + $0xc0] sm:$0xff]  ;;  %1191 = vmatprep.subr.bf16.mxu0 %v3478_v26  ;;  %v3605_v34 = vcombine.low %v260_v20, %v264_v21  ;;  %v3479_v20 = vcombine.low %v133_v9, %v137_v10  ;;  %v3488_v22 = vcombine.high %v141_v17, %v145_v18  ;;  %v149_v26 = vld [vmem:[#allocation5 + $0x108] sm:$0xff] }
  0x68   :  { %v144_v29 = vld [vmem:[#allocation5 + $0xe0] sm:$0xff]  ;;  %1192 = vmatpush1.bf16.msra.mxu0 %v3477_v32  ;;  %1219 = vmatprep.mubr.bf16.mxu0 %v4591_v56 }
  0x69   :  { %v268_v30 = vld [vmem:[#allocation5 + $0x4c0] sm:$0xff]  ;;  %v3486_v35 = vcombine.high %v140_v28, %v144_v29  ;;  %1232 = vmatprep.subr.bf16.mxu1 %v3606_v27  ;;  %v3485_v43 = vcombine.low %v140_v28, %v144_v29  ;;  %v153_v27 = vld [vmem:[#allocation5 + $0x128] sm:$0xff]  ;;  %v3487_v29 = vcombine.low %v141_v17, %v145_v18 }
  0x6a   :  { %v272_v31 = vld [vmem:[#allocation5 + $0x4e0] sm:$0xff]  ;;  %1233 = vmatpush1.bf16.msra.mxu1 %v3605_v34  ;;  %v157_v34 = vld [vmem:[#allocation5 + $0x148] sm:$0xff] }
  0x6b   :  { %v3614_v37 = vcombine.high %v268_v30, %v272_v31  ;;  %v148_v38 = vld [vmem:[#allocation5 + $0x100] sm:$0xff]  ;;  %1193 = vmatprep.subr.bf16.mxu0 %v3486_v35  ;;  %v3613_v46 = vcombine.low %v268_v30, %v272_v31  ;;  %v3496_v31 = vcombine.high %v149_v26, %v153_v27  ;;  %v161_v35 = vld [vmem:[#allocation5 + $0x168] sm:$0xff] }
  0x6c   :  { %v152_v39 = vld [vmem:[#allocation5 + $0x120] sm:$0xff]  ;;  %1194 = vmatpush1.bf16.msra.mxu0 %v3485_v43  ;;  %v165_v43 = vld [vmem:[#allocation5 + $0x188] sm:$0xff] }
  0x6d   :  { %v276_v41 = vld [vmem:[#allocation5 + $0x500] sm:$0xff]  ;;  %v3494_v47 = vcombine.high %v148_v38, %v152_v39  ;;  %1234 = vmatprep.subr.bf16.mxu1 %v3614_v37  ;;  %v3493_v54 = vcombine.low %v148_v38, %v152_v39  ;;  %v3495_v37 = vcombine.low %v149_v26, %v153_v27  ;;  %v3504_v39 = vcombine.high %v157_v34, %v161_v35 }
  0x6e   :  { %v280_v42 = vld [vmem:[#allocation5 + $0x520] sm:$0x33]  ;;  %1235 = vmatpush1.bf16.msra.mxu1 %v3613_v46  ;;  %v3503_v46 = vcombine.low %v157_v34, %v161_v35  ;;  %v4603_v34 = vpack.c.bf16 %v4587_v40, %v4587_v40 }
  0x6f   :  { %v3622_v48 = vcombine.high %v276_v41, %v280_v42  ;;  %v3621_v49 = vcombine.low %v276_v41, %v280_v42  ;;  %v156_v50 = vld [vmem:[#allocation5 + $0x140] sm:$0xff]  ;;  %1195 = vmatprep.subr.bf16.mxu0 %v3494_v47 }
  0x70   :  { %v160_v51 = vld [vmem:[#allocation5 + $0x160] sm:$0xff]  ;;  %1196 = vmatpush1.bf16.msra.mxu0 %v3493_v54  ;;  %v3511_v54 = vcombine.low %v165_v43, %v169_v44 }
  0x71   :  { %v3502_v57 = vcombine.high %v156_v50, %v160_v51  ;;  %3629 = vmatprep.subr.msk.bf16.mxu1 %vm1162_vm0, %v3622_v48  ;;  %v1164_v58 = vsel %vm1162_vm0, %v3621_v49, 0  ;;  %v164_v60 = vld [vmem:[#allocation5 + $0x180] sm:$0xff]  ;;  %v3501_v1 = vcombine.low %v156_v50, %v160_v51  ;;  %v3512_v48 = vcombine.high %v165_v43, %v169_v44  ;;  %v173_v51 = vld [vmem:[#allocation5 + $0x1c8] sm:$0xff] }
  0x72   :  { %v168_v61 = vld [vmem:[#allocation5 + $0x1a0] sm:$0xff]  ;;  %1237 = vmatpush1.bf16.msra.mxu1 %v1164_v58  ;;  %v3519_v63 = vcombine.low %v173_v51, %v177_v52 }
  0x73   :  { %1197 = vmatprep.subr.bf16.mxu0 %v3502_v57  ;;  %v3510_v4 = vcombine.high %v164_v60, %v168_v61  ;;  %1269 = vmatprep.subr.bf16.mxu1 %v3464_v59  ;;  %v172_v7 = vld [vmem:[#allocation5 + $0x1c0] sm:$0xff]  ;;  %v3509_v11 = vcombine.low %v164_v60, %v168_v61  ;;  %v3520_v57 = vcombine.high %v173_v51, %v177_v52  ;;  %v181_v60 = vld [vmem:[#allocation5 + $0x208] sm:$0xff] }
  0x74   :  { %v176_v8 = vld [vmem:[#allocation5 + $0x1e0] sm:$0xff]  ;;  %1198 = vmatpush1.bf16.msra.mxu0 %v3501_v1  ;;  %v185_v61 = vld [vmem:[#allocation5 + $0x228] sm:$0xff] }
  0x75   :  { %3630 = vmatmul.mubr.msk.bf16.vlgmr.msra.gmra.mrb[0].mxu1 %vm1158_vm1, %v4596_v2  ;;  %1199 = vmatprep.subr.bf16.mxu0 %v3510_v4  ;;  %v3518_v13 = vcombine.high %v172_v7, %v176_v8  ;;  %v180_v15 = vld [vmem:[#allocation5 + $0x200] sm:$0xff]  ;;  %v3517_v19 = vcombine.low %v172_v7, %v176_v8  ;;  %v189_v7 = vld [vmem:[#allocation5 + $0x248] sm:$0xff] }
  0x76   :  { %1270 = vmatpush1.bf16.msra.mxu1 %v3463_v3  ;;  %v184_v16 = vld [vmem:[#allocation5 + $0x220] sm:$0xff]  ;;  %1301 = vmatprep.mubr.bf16.mxu1 %v4591_v56  ;;  %v3528_v3 = vcombine.high %v181_v60, %v185_v61  ;;  %v193_v8 = vld [vmem:[#allocation5 + $0x268] sm:$0xff] }
  0x77   :  { %1271 = vmatprep.subr.bf16.mxu1 %v3472_v5  ;;  %v3526_v21 = vcombine.high %v180_v15, %v184_v16  ;;  %v188_v23 = vld [vmem:[#allocation5 + $0x240] sm:$0xff]  ;;  %v3525_v28 = vcombine.low %v180_v15, %v184_v16  ;;  %v201_v15 = vld [vmem:[#allocation5 + $0x2a8] sm:$0xff]  ;;  %v3536_v16 = vcombine.high %v189_v7, %v193_v8  ;;  %v3535_v18 = vcombine.low %v189_v7, %v193_v8  ;;  %v166_v8 = vld [vmem:[#allocation5 + $0x190] sm:$0xff] }
  0x78   :  { %1200 = vmatpush1.bf16.msra.mxu0 %v3509_v11  ;;  %v192_v25 = vld [vmem:[#allocation5 + $0x260] sm:$0xff] }
  0x79   :  { %1201 = vmatprep.subr.bf16.mxu0 %v3518_v13  ;;  %v3534_v30 = vcombine.high %v188_v23, %v192_v25  ;;  %v196_v32 = vld [vmem:[#allocation5 + $0x280] sm:$0xff]  ;;  %v3533_v36 = vcombine.low %v188_v23, %v192_v25  ;;  %v122_v23 = vld [vmem:[#allocation5 + $0x30] sm:$0xff] }
  0x7a   :  { %1272 = vmatpush1.bf16.msra.mxu1 %v3471_v12  ;;  %v200_v33 = vld [vmem:[#allocation5 + $0x2a0] sm:$0xff]  ;;  %v3527_v12 = vcombine.low %v181_v60, %v185_v61 }
  0x7b   :  { %1273 = vmatprep.subr.bf16.mxu1 %v3480_v14  ;;  %v3542_v38 = vcombine.high %v196_v32, %v200_v33  ;;  %v204_v41 = vld [vmem:[#allocation5 + $0x2c0] sm:$0xff]  ;;  %v3541_v45 = vcombine.low %v196_v32, %v200_v33  ;;  %v197_v14 = vld [vmem:[#allocation5 + $0x288] sm:$0xff]  ;;  %v130_v32 = vld [vmem:[#allocation5 + $0x70] sm:$0xff] }
  0x7c   :  { %1202 = vmatpush1.bf16.msra.mxu0 %v3517_v19  ;;  %v208_v42 = vld [vmem:[#allocation5 + $0x2e0] sm:$0xff]  ;;  %v3544_v25 = vcombine.high %v197_v14, %v201_v15  ;;  %v3543_v27 = vcombine.low %v197_v14, %v201_v15 }
  0x7d   :  { %1203 = vmatprep.subr.bf16.mxu0 %v3526_v21  ;;  %v3550_v47 = vcombine.high %v204_v41, %v208_v42  ;;  %v212_v49 = vld [vmem:[#allocation5 + $0x300] sm:$0xff]  ;;  %v3549_v53 = vcombine.low %v204_v41, %v208_v42  ;;  %v209_v21 = vld [vmem:[#allocation5 + $0x2e8] sm:$0xff]  ;;  %v134_v41 = vld [vmem:[#allocation5 + $0x90] sm:$0xff] }
  0x7e   :  { %1274 = vmatpush1.bf16.msra.mxu1 %v3479_v20  ;;  %v216_v50 = vld [vmem:[#allocation5 + $0x320] sm:$0xff]  ;;  %v205_v20 = vld [vmem:[#allocation5 + $0x2c8] sm:$0xff]  ;;  %v138_v42 = vld [vmem:[#allocation5 + $0xb0] sm:$0xff] }
  0x7f   :  { %1275 = vmatprep.subr.bf16.mxu1 %v3488_v22  ;;  %v3558_v55 = vcombine.high %v212_v49, %v216_v50  ;;  %v220_v58 = vld [vmem:[#allocation5 + $0x340] sm:$0xff]  ;;  %v3557_v62 = vcombine.low %v212_v49, %v216_v50  ;;  %v118_v22 = vld [vmem:[#allocation5 + $0x10] sm:$0xff]  ;;  %v3552_v33 = vcombine.high %v205_v20, %v209_v21  ;;  %v3481_v51 = vcombine.low %v134_v41, %v138_v42 }
  0x80   :  { %1204 = vmatpush1.bf16.msra.mxu0 %v3525_v28  ;;  %v224_v59 = vld [vmem:[#allocation5 + $0x360] sm:$0xff]  ;;  %v213_v28 = vld [vmem:[#allocation5 + $0x308] sm:$0xff]  ;;  %v3465_v35 = vcombine.low %v118_v22, %v122_v23  ;;  %v146_v49 = vld [vmem:[#allocation5 + $0xf0] sm:$0xff] }
  0x81   :  { %1205 = vmatprep.subr.bf16.mxu0 %v3534_v30  ;;  %v3566_v1 = vcombine.high %v220_v58, %v224_v59  ;;  %v228_v4 = vld [vmem:[#allocation5 + $0x380] sm:$0xff]  ;;  %v3565_v9 = vcombine.low %v220_v58, %v224_v59  ;;  %v3466_v30 = vcombine.high %v118_v22, %v122_v23  ;;  %v154_v58 = vld [vmem:[#allocation5 + $0x130] sm:$0xff]  ;;  %v265_v22 = vld [vmem:[#allocation5 + $0x4a8] sm:$0xff] }
  0x82   :  { %1276 = vmatpush1.bf16.msra.mxu1 %v3487_v29  ;;  %v232_v5 = vld [vmem:[#allocation5 + $0x3a0] sm:$0xff]  ;;  %v217_v29 = vld [vmem:[#allocation5 + $0x328] sm:$0xff] }
  0x83   :  { %1277 = vmatprep.subr.bf16.mxu1 %v3496_v31  ;;  %v236_v10 = vld [vmem:[#allocation5 + $0x3c0] sm:$0xff]  ;;  %v3574_v13 = vcombine.high %v228_v4, %v232_v5  ;;  %v3573_v17 = vcombine.low %v228_v4, %v232_v5  ;;  %v126_v31 = vld [vmem:[#allocation5 + $0x50] sm:$0xff]  ;;  %v3560_v43 = vcombine.high %v213_v28, %v217_v29  ;;  %v3559_v40 = vcombine.low %v213_v28, %v217_v29 }
  0x84   :  { %1206 = vmatpush1.bf16.msra.mxu0 %v3533_v36  ;;  %v240_v11 = vld [vmem:[#allocation5 + $0x3e0] sm:$0xff]  ;;  %v3551_v36 = vcombine.low %v205_v20, %v209_v21  ;;  %v3473_v44 = vcombine.low %v126_v31, %v130_v32  ;;  %v162_v4 = vld [vmem:[#allocation5 + $0x170] sm:$0xff]  ;;  %v261_v21 = vld [vmem:[#allocation5 + $0x488] sm:$0xff] }
  0x85   :  { %1207 = vmatprep.subr.bf16.mxu0 %v3542_v38  ;;  %v3582_v19 = vcombine.high %v236_v10, %v240_v11  ;;  %v3581_v26 = vcombine.low %v236_v10, %v240_v11  ;;  %v225_v38 = vld [vmem:[#allocation5 + $0x368] sm:$0xff]  ;;  %v178_v20 = vld [vmem:[#allocation5 + $0x1f0] sm:$0xff] }
  0x86   :  { %1278 = vmatpush1.bf16.msra.mxu1 %v3495_v37  ;;  %v221_v37 = vld [vmem:[#allocation5 + $0x348] sm:$0xff]  ;;  %v182_v29 = vld [vmem:[#allocation5 + $0x210] sm:$0xff] }
  0x87   :  { %1279 = vmatprep.subr.bf16.mxu1 %v3504_v39  ;;  %v3474_v39 = vcombine.high %v126_v31, %v130_v32  ;;  %v3568_v50 = vcombine.high %v221_v37, %v225_v38  ;;  %v3567_v52 = vcombine.low %v221_v37, %v225_v38  ;;  %v253_v11 = vld [vmem:[#allocation5 + $0x448] sm:$0xff]  ;;  %v186_v31 = vld [vmem:[#allocation5 + $0x230] sm:$0xff] }
  0x88   :  { %1208 = vmatpush1.bf16.msra.mxu0 %v3541_v45  ;;  %v229_v45 = vld [vmem:[#allocation5 + $0x388] sm:$0xff] }
  0x89   :  { %1209 = vmatprep.subr.bf16.mxu0 %v3550_v47  ;;  %v3482_v47 = vcombine.high %v134_v41, %v138_v42  ;;  %v277_v37 = vld [vmem:[#allocation5 + $0x508] sm:$0xff]  ;;  %v3529_v42 = vcombine.low %v182_v29, %v186_v31 }
  0x8a   :  { %1280 = vmatpush1.bf16.msra.mxu1 %v3503_v46  ;;  %v233_v46 = vld [vmem:[#allocation5 + $0x3a8] sm:$0xff] }
  0x8b   :  { %1281 = vmatprep.subr.bf16.mxu1 %v3512_v48  ;;  %v142_v48 = vld [vmem:[#allocation5 + $0xd0] sm:$0xff]  ;;  %v3576_v59 = vcombine.high %v229_v45, %v233_v46  ;;  %v3575_v61 = vcombine.low %v229_v45, %v233_v46  ;;  %v281_v38 = vld [vmem:[#allocation5 + $0x528] sm:$0x33] }
  0x8c   :  { %1210 = vmatpush1.bf16.msra.mxu0 %v3549_v53  ;;  %v237_v53 = vld [vmem:[#allocation5 + $0x3c8] sm:$0xff]  ;;  %v3489_v60 = vcombine.low %v142_v48, %v146_v49  ;;  %v246_v45 = vld [vmem:[#allocation5 + $0x410] sm:$0xff] }
  0x8d   :  { %1211 = vmatprep.subr.bf16.mxu0 %v3558_v55  ;;  %v3490_v55 = vcombine.high %v142_v48, %v146_v49  ;;  %v250_v46 = vld [vmem:[#allocation5 + $0x430] sm:$0xff]  ;;  %v3624_v48 = vcombine.high %v277_v37, %v281_v38  ;;  %v3623_v49 = vcombine.low %v277_v37, %v281_v38 }
  0x8e   :  { %1282 = vmatpush1.bf16.msra.mxu1 %v3511_v54  ;;  %v241_v54 = vld [vmem:[#allocation5 + $0x3e8] sm:$0xff] }
  0x8f   :  { %1283 = vmatprep.subr.bf16.mxu1 %v3520_v57  ;;  %v150_v57 = vld [vmem:[#allocation5 + $0x110] sm:$0xff]  ;;  %v3584_v5 = vcombine.high %v237_v53, %v241_v54  ;;  %v3583_v10 = vcombine.low %v237_v53, %v241_v54 }
  0x90   :  { %1212 = vmatpush1.bf16.msra.mxu0 %v3557_v62  ;;  %v245_v62 = vld [vmem:[#allocation5 + $0x408] sm:$0xff]  ;;  %v3497_v7 = vcombine.low %v150_v57, %v154_v58  ;;  %v254_v53 = vld [vmem:[#allocation5 + $0x450] sm:$0xff] }
  0x91   :  { %1213 = vmatprep.subr.bf16.mxu0 %v3566_v1  ;;  %v3498_v1 = vcombine.high %v150_v57, %v154_v58  ;;  %v258_v54 = vld [vmem:[#allocation5 + $0x470] sm:$0xff]  ;;  %v1170_v57 = vsel %vm1162_vm0, %v3623_v49, 0  ;;  %v3594_v58 = vcombine.high %v246_v45, %v250_v46  ;;  %v147_v49 = vld [vmem:[#allocation5 + $0xf8] sm:$0xff] }
  0x92   :  { %1284 = vmatpush1.bf16.msra.mxu1 %v3519_v63  ;;  %v249_v63 = vld [vmem:[#allocation5 + $0x428] sm:$0xff] }
  0x93   :  { %1285 = vmatprep.subr.bf16.mxu1 %v3528_v3  ;;  %v158_v3 = vld [vmem:[#allocation5 + $0x150] sm:$0xff]  ;;  %v3592_v14 = vcombine.high %v245_v62, %v249_v63 }
  0x94   :  { %1214 = vmatpush1.bf16.msra.mxu0 %v3565_v9  ;;  %v170_v9 = vld [vmem:[#allocation5 + $0x1b0] sm:$0xff]  ;;  %v3505_v15 = vcombine.low %v158_v3, %v162_v4 }
  0x95   :  { %1215 = vmatprep.subr.bf16.mxu0 %v3574_v13  ;;  %v3506_v13 = vcombine.high %v158_v3, %v162_v4  ;;  %v3513_v23 = vcombine.low %v166_v8, %v170_v9  ;;  %v3602_v3 = vcombine.high %v254_v53, %v258_v54  ;;  %v266_v4 = vld [vmem:[#allocation5 + $0x4b0] sm:$0xff] }
  0x96   :  { %1286 = vmatpush1.bf16.msra.mxu1 %v3527_v12  ;;  %v257_v12 = vld [vmem:[#allocation5 + $0x468] sm:$0xff] }
  0x97   :  { %1287 = vmatprep.subr.bf16.mxu1 %v3536_v16  ;;  %v3591_v16 = vcombine.low %v245_v62, %v249_v63  ;;  %v3593_v62 = vcombine.low %v246_v45, %v250_v46  ;;  %v262_v63 = vld [vmem:[#allocation5 + $0x490] sm:$0xff] }
  0x98   :  { %1216 = vmatpush1.bf16.msra.mxu0 %v3573_v17  ;;  %v3514_v17 = vcombine.high %v166_v8, %v170_v9  ;;  %v3610_v9 = vcombine.high %v262_v63, %v266_v4  ;;  %v4044_v45 = vld [vmem:[#allocation8] ss:$12 sps:$4 sm:$0xff]   ;;  %v4049_v46 = vld [vmem:[#allocation8 + $0x1c] ss:$12 sps:$4 sm:$0xff]  }
  0x99   :  { %1217 = vmatprep.subr.bf16.mxu0 %v3582_v19  ;;  %v174_v19 = vld [vmem:[#allocation5 + $0x1d0] sm:$0xff] }
  0x9a   :  { %1288 = vmatpush1.bf16.msra.mxu1 %v3535_v18  ;;  %v3600_v18 = vcombine.high %v253_v11, %v257_v12  ;;  %v3522_v28 = vcombine.high %v174_v19, %v178_v20  ;;  %v3521_v32 = vcombine.low %v174_v19, %v178_v20  ;;  %v234_v19 = vld [vmem:[#allocation5 + $0x3b0] sm:$0xff] }
  0x9b   :  { %1289 = vmatprep.subr.bf16.mxu1 %v3544_v25  ;;  %v3599_v25 = vcombine.low %v253_v11, %v257_v12  ;;  %v226_v11 = vld [vmem:[#allocation5 + $0x370] sm:$0xff] }
  0x9c   :  { %1218 = vmatpush1.bf16.msra.mxu0 %v3581_v26  ;;  %v269_v26 = vld [vmem:[#allocation5 + $0x4c8] sm:$0xff]  ;;  %v270_v12 = vld [vmem:[#allocation5 + $0x4d0] sm:$0xff] }
  0x9d   :  { %1351 = vmatprep.subr.bf16.mxu0 %v3466_v30  ;;  %v3608_v30 = vcombine.high %v261_v21, %v265_v22  ;;  %v278_v20 = vld [vmem:[#allocation5 + $0x510] sm:$0xff] }
  0x9e   :  { %1290 = vmatpush1.bf16.msra.mxu1 %v3543_v27  ;;  %v273_v27 = vld [vmem:[#allocation5 + $0x4e8] sm:$0xff] }
  0x9f   :  { %1291 = vmatprep.subr.bf16.mxu1 %v3552_v33  ;;  %1220 = vmatmul.mubr.bf16.vlgmr.msra.gmra.mrb[0].mxu0 %v4603_v34  ;;  %v190_v33 = vld [vmem:[#allocation5 + $0x250] sm:$0xff]  ;;  %v3616_v41 = vcombine.high %v269_v26, %v273_v27 }
  0xa0   :  { %1352 = vmatpush1.bf16.msra.mxu0 %v3465_v35  ;;  %1383 = vmatprep.mubr.bf16.mxu0 %v4591_v56  ;;  %v194_v35 = vld [vmem:[#allocation5 + $0x270] sm:$0xff] }
  0xa1   :  { %1353 = vmatprep.subr.bf16.mxu0 %v3474_v39  ;;  %v3530_v39 = vcombine.high %v182_v29, %v186_v31 }
  0xa2   :  { %1292 = vmatpush1.bf16.msra.mxu1 %v3551_v36  ;;  %v3607_v36 = vcombine.low %v261_v21, %v265_v22  ;;  %v282_v21 = vld [vmem:[#allocation5 + $0x530] sm:$0x33] }
  0xa3   :  { %1293 = vmatprep.subr.bf16.mxu1 %v3560_v43  ;;  %v198_v43 = vld [vmem:[#allocation5 + $0x290] sm:$0xff]  ;;  %v3625_v31 = vcombine.low %v278_v20, %v282_v21 }
  0xa4   :  { %1354 = vmatpush1.bf16.msra.mxu0 %v3473_v44  ;;  %v202_v44 = vld [vmem:[#allocation5 + $0x2b0] sm:$0xff] }
  0xa5   :  { %1355 = vmatprep.subr.bf16.mxu0 %v3482_v47  ;;  %v3538_v47 = vcombine.high %v190_v33, %v194_v35  ;;  %v1176_v37 = vsel %vm1162_vm0, %v3625_v31, 0  ;;  %v4070_v31 = vld [vmem:[#allocation8 + $0xc4] ss:$12 sps:$4 sm:$0xff]  }
  0xa6   :  { %1294 = vmatpush1.bf16.msra.mxu1 %v3559_v40  ;;  %v3615_v40 = vcombine.low %v269_v26, %v273_v27  ;;  %v119_v27 = vld [vmem:[#allocation5 + $0x18] sm:$0xff] }
  0xa7   :  { %1295 = vmatprep.subr.bf16.mxu1 %v3568_v50  ;;  %v3537_v50 = vcombine.low %v190_v33, %v194_v35  ;;  %v127_v33 = vld [vmem:[#allocation5 + $0x58] sm:$0xff] }
  0xa8   :  { %1356 = vmatpush1.bf16.msra.mxu0 %v3481_v51  ;;  %v206_v51 = vld [vmem:[#allocation5 + $0x2d0] sm:$0xff]  ;;  %v131_v35 = vld [vmem:[#allocation5 + $0x78] sm:$0xff] }
  0xa9   :  { %1357 = vmatprep.subr.bf16.mxu0 %v3490_v55  ;;  %v3546_v55 = vcombine.high %v198_v43, %v202_v44 }
  0xaa   :  { %1296 = vmatpush1.bf16.msra.mxu1 %v3567_v52  ;;  %v210_v52 = vld [vmem:[#allocation5 + $0x2f0] sm:$0xff] }
  0xab   :  { %1297 = vmatprep.subr.bf16.mxu1 %v3576_v59  ;;  %v3545_v59 = vcombine.low %v198_v43, %v202_v44  ;;  %v135_v43 = vld [vmem:[#allocation5 + $0x98] sm:$0xff] }
  0xac   :  { %1358 = vmatpush1.bf16.msra.mxu0 %v3489_v60  ;;  %v214_v60 = vld [vmem:[#allocation5 + $0x310] sm:$0xff]  ;;  %v139_v44 = vld [vmem:[#allocation5 + $0xb8] sm:$0xff] }
  0xad   :  { %1359 = vmatprep.subr.bf16.mxu0 %v3498_v1  ;;  %v3554_v1 = vcombine.high %v206_v51, %v210_v52 }
  0xae   :  { %1298 = vmatpush1.bf16.msra.mxu1 %v3575_v61  ;;  %v218_v61 = vld [vmem:[#allocation5 + $0x330] sm:$0xff] }
  0xaf   :  { %1299 = vmatprep.subr.bf16.mxu1 %v3584_v5  ;;  %v3553_v5 = vcombine.low %v206_v51, %v210_v52  ;;  %v3562_v8 = vcombine.high %v214_v60, %v218_v61  ;;  %v4047_v51 = vld [vmem:[#allocation8 + $0x18] ss:$12 sps:$4 sm:$0xff]   ;;  %v4052_v52 = vld [vmem:[#allocation8 + $0x34] ss:$12 sps:$4 sm:$0xff]  }
  0xb0   :  { %1360 = vmatpush1.bf16.msra.mxu0 %v3497_v7  ;;  %v3601_v7 = vcombine.low %v254_v53, %v258_v54  ;;  %v3483_v53 = vcombine.low %v135_v43, %v139_v44  ;;  %v151_v54 = vld [vmem:[#allocation5 + $0x118] sm:$0xff] }
  0xb1   :  { %1361 = vmatprep.subr.bf16.mxu0 %v3506_v13  ;;  %v274_v13 = vld [vmem:[#allocation5 + $0x4f0] sm:$0xff] }
  0xb2   :  { %1300 = vmatpush1.bf16.msra.mxu1 %v3583_v10  ;;  %v222_v10 = vld [vmem:[#allocation5 + $0x350] sm:$0xff]  ;;  %v3617_v26 = vcombine.low %v270_v12, %v274_v13 }
  0xb3   :  { %1310 = vmatprep.subr.bf16.mxu1 %v3592_v14  ;;  %v3561_v14 = vcombine.low %v214_v60, %v218_v61  ;;  %v3569_v22 = vcombine.low %v222_v10, %v226_v11  ;;  %v159_v60 = vld [vmem:[#allocation5 + $0x158] sm:$0xff] }
  0xb4   :  { %1362 = vmatpush1.bf16.msra.mxu0 %v3505_v15  ;;  %v3609_v15 = vcombine.low %v262_v63, %v266_v4  ;;  %v163_v61 = vld [vmem:[#allocation5 + $0x178] sm:$0xff] }
  0xb5   :  { %1302 = vmatmul.mubr.bf16.vlgmr.msra.gmra.mrb[4].mxu1 %v4603_v34  ;;  %1363 = vmatprep.subr.bf16.mxu0 %v3514_v17  ;;  %v3618_v17 = vcombine.high %v270_v12, %v274_v13  ;;  %v4053_v63 = vld [vmem:[#allocation8 + $0x48] ss:$12 sps:$4 sm:$0xff]  }
  0xb6   :  { %1311 = vmatpush1.bf16.msra.mxu1 %v3591_v16  ;;  %1342 = vmatprep.mubr.bf16.mxu1 %v4477_v0  ;;  %v3570_v16 = vcombine.high %v222_v10, %v226_v11  ;;  %v167_v4 = vld [vmem:[#allocation5 + $0x198] sm:$0xff]  ;;  %v3507_v10 = vcombine.low %v159_v60, %v163_v61 }
  0xb7   :  { %1312 = vmatprep.subr.bf16.mxu1 %v3600_v18  ;;  %v230_v18 = vld [vmem:[#allocation5 + $0x390] sm:$0xff]  ;;  %v175_v11 = vld [vmem:[#allocation5 + $0x1d8] sm:$0xff] }
  0xb8   :  { %1364 = vmatpush1.bf16.msra.mxu0 %v3513_v23  ;;  %v238_v23 = vld [vmem:[#allocation5 + $0x3d0] sm:$0xff]  ;;  %v3578_v29 = vcombine.high %v230_v18, %v234_v19  ;;  %v179_v12 = vld [vmem:[#allocation5 + $0x1f8] sm:$0xff] }
  0xb9   :  { %1365 = vmatprep.subr.bf16.mxu0 %v3522_v28  ;;  %v123_v28 = vld [vmem:[#allocation5 + $0x38] sm:$0xff] }
  0xba   :  { %1313 = vmatpush1.bf16.msra.mxu1 %v3599_v25  ;;  %v242_v25 = vld [vmem:[#allocation5 + $0x3f0] sm:$0xff]  ;;  %v3468_v38 = vcombine.high %v119_v27, %v123_v28 }
  0xbb   :  { %1314 = vmatprep.subr.bf16.mxu1 %v3608_v30  ;;  %v3626_v30 = vcombine.high %v278_v20, %v282_v21  ;;  %v4062_v20 = vld [vmem:[#allocation8 + $0x90] ss:$12 sps:$4 sm:$0xff]   ;;  %v3523_v21 = vcombine.low %v175_v11, %v179_v12 }
  0xbc   :  { %1366 = vmatpush1.bf16.msra.mxu0 %v3521_v32  ;;  %v3577_v32 = vcombine.low %v230_v18, %v234_v19  ;;  %v3524_v18 = vcombine.high %v175_v11, %v179_v12  ;;  %v187_v19 = vld [vmem:[#allocation5 + $0x238] sm:$0xff]  ;;  %v4105_v11 = vld [vmem:[#allocation8 + $0x16c] ss:$12 sps:$4 sm:$0xff]  }
  0xbd   :  { %1367 = vmatprep.subr.bf16.mxu0 %v3530_v39  ;;  %v3585_v39 = vcombine.low %v238_v23, %v242_v25 }
  0xbe   :  { %1315 = vmatpush1.bf16.msra.mxu1 %v3607_v36  ;;  %v3586_v36 = vcombine.high %v238_v23, %v242_v25  ;;  %v4067_v23 = vld [vmem:[#allocation8 + $0xac] ss:$12 sps:$4 sm:$0xff]  }
  0xbf   :  { %1316 = vmatprep.subr.bf16.mxu1 %v3616_v41  ;;  %v4046_v41 = vld [vmem:[#allocation8 + $0x4] ss:$12 sps:$4 sm:$0xff]  }
  0xc0   :  { %1368 = vmatpush1.bf16.msra.mxu0 %v3529_v42  ;;  %v3467_v42 = vcombine.low %v119_v27, %v123_v28  ;;  %v4065_v27 = vld [vmem:[#allocation8 + $0xa8] ss:$12 sps:$4 sm:$0xff]  }
  0xc1   :  { %1369 = vmatprep.subr.bf16.mxu0 %v3538_v47  ;;  %v3475_v47 = vcombine.low %v127_v33, %v131_v35 }
  0xc2   :  { %1317 = vmatpush1.bf16.msra.mxu1 %v3615_v40  ;;  %v3476_v40 = vcombine.high %v127_v33, %v131_v35  ;;  %v4068_v33 = vld [vmem:[#allocation8 + $0xc0] ss:$12 sps:$4 sm:$0xff]   ;;  %v4075_v35 = vld [vmem:[#allocation8 + $0xdc] ss:$12 sps:$4 sm:$0xff]  }
  0xc3   :  { %3631 = vmatprep.subr.msk.bf16.mxu1 %vm1162_vm0, %v3624_v48  ;;  %v143_v48 = vld [vmem:[#allocation5 + $0xd8] sm:$0xff] }
  0xc4   :  { %1370 = vmatpush1.bf16.msra.mxu0 %v3537_v50  ;;  %v3484_v50 = vcombine.high %v135_v43, %v139_v44  ;;  %v4080_v43 = vld [vmem:[#allocation8 + $0xf4] ss:$12 sps:$4 sm:$0xff]  }
  0xc5   :  { %1371 = vmatprep.subr.bf16.mxu0 %v3546_v55  ;;  %v155_v55 = vld [vmem:[#allocation5 + $0x138] sm:$0xff] }
  0xc6   :  { %1319 = vmatpush1.bf16.msra.mxu1 %v1170_v57  ;;  %v3492_v57 = vcombine.high %v143_v48, %v147_v49 }
  0xc7   :  { %1392 = vmatprep.subr.bf16.mxu1 %v3594_v58  ;;  %v4050_v58 = vld [vmem:[#allocation8 + $0x30] ss:$12 sps:$4 sm:$0xff]  }
  0xc8   :  { %1372 = vmatpush1.bf16.msra.mxu0 %v3545_v59  ;;  %v4055_v59 = vld [vmem:[#allocation8 + $0x4c] ss:$12 sps:$4 sm:$0xff]  }
  0xc9   :  { %3632 = vmatmul.mubr.msk.bf16.vlgmr.msra.gmra.mrb[4].mxu1 %vm1158_vm1, %v4596_v2  ;;  %1373 = vmatprep.subr.bf16.mxu0 %v3554_v1  ;;  %v4058_v1 = vld [vmem:[#allocation8 + $0x64] ss:$12 sps:$4 sm:$0xff]  }
  0xca   :  { %1393 = vmatpush1.bf16.msra.mxu1 %v3593_v62  ;;  %1424 = vmatprep.mubr.bf16.mxu1 %v4477_v0  ;;  %v3500_v62 = vcombine.high %v151_v54, %v155_v55 }
  0xcb   :  { %1394 = vmatprep.subr.bf16.mxu1 %v3602_v3  ;;  %v3499_v3 = vcombine.low %v151_v54, %v155_v55  ;;  %v4090_v54 = vld [vmem:[#allocation8 + $0x124] ss:$12 sps:$4 sm:$0xff]  }
  0xcc   :  { %1374 = vmatpush1.bf16.msra.mxu0 %v3553_v5  ;;  %v171_v5 = vld [vmem:[#allocation5 + $0x1b8] sm:$0xff] }
  0xcd   :  { %1375 = vmatprep.subr.bf16.mxu0 %v3562_v8  ;;  %v4056_v8 = vld [vmem:[#allocation8 + $0x60] ss:$12 sps:$4 sm:$0xff]   ;;  %v3516_v13 = vcombine.high %v167_v4, %v171_v5 }
  0xce   :  { %1395 = vmatpush1.bf16.msra.mxu1 %v3601_v7  ;;  %v3508_v7 = vcombine.high %v159_v60, %v163_v61  ;;  %v4095_v60 = vld [vmem:[#allocation8 + $0x13c] ss:$12 sps:$4 sm:$0xff]  }
  0xcf   :  { %1396 = vmatprep.subr.bf16.mxu1 %v3610_v9  ;;  %v4061_v9 = vld [vmem:[#allocation8 + $0x7c] ss:$12 sps:$4 sm:$0xff]  }
  0xd0   :  { %1376 = vmatpush1.bf16.msra.mxu0 %v3561_v14  ;;  %v4059_v14 = vld [vmem:[#allocation8 + $0x78] ss:$12 sps:$4 sm:$0xff]  }
  0xd1   :  { %1377 = vmatprep.subr.bf16.mxu0 %v3570_v16  ;;  %v183_v16 = vld [vmem:[#allocation5 + $0x218] sm:$0xff] }
  0xd2   :  { %1397 = vmatpush1.bf16.msra.mxu1 %v3609_v15  ;;  %v3515_v15 = vcombine.low %v167_v4, %v171_v5  ;;  %v3532_v25 = vcombine.high %v183_v16, %v187_v19  ;;  %v3531_v28 = vcombine.low %v183_v16, %v187_v19  ;;  %v4100_v4 = vld [vmem:[#allocation8 + $0x154] ss:$12 sps:$4 sm:$0xff]  }
  0xd3   :  { %1398 = vmatprep.subr.bf16.mxu1 %v3618_v17  ;;  %v4064_v17 = vld [vmem:[#allocation8 + $0x94] ss:$12 sps:$4 sm:$0xff]  }
  0xd4   :  { %1378 = vmatpush1.bf16.msra.mxu0 %v3569_v22  ;;  %v191_v22 = vld [vmem:[#allocation5 + $0x258] sm:$0xff] }
  0xd5   :  { %1379 = vmatprep.subr.bf16.mxu0 %v3578_v29  ;;  %v199_v29 = vld [vmem:[#allocation5 + $0x298] sm:$0xff] }
  0xd6   :  { %1399 = vmatpush1.bf16.msra.mxu1 %v3617_v26  ;;  %v195_v26 = vld [vmem:[#allocation5 + $0x278] sm:$0xff] }
  0xd7   :  { %3633 = vmatprep.subr.msk.bf16.mxu1 %vm1162_vm0, %v3626_v30  ;;  %v203_v30 = vld [vmem:[#allocation5 + $0x2b8] sm:$0xff] }
  0xd8   :  { %1380 = vmatpush1.bf16.msra.mxu0 %v3577_v32  ;;  %v3540_v32 = vcombine.high %v191_v22, %v195_v26  ;;  %v263_v19 = vld [vmem:[#allocation5 + $0x498] sm:$0xff] }
  0xd9   :  { %1381 = vmatprep.subr.bf16.mxu0 %v3586_v36  ;;  %v3539_v36 = vcombine.low %v191_v22, %v195_v26 }
  0xda   :  { %1401 = vmatpush1.bf16.msra.mxu1 %v1176_v37  ;;  %v207_v37 = vld [vmem:[#allocation5 + $0x2d8] sm:$0xff] }
  0xdb   :  { %1433 = vmatprep.subr.bf16.mxu1 %v3468_v38  ;;  %v3548_v38 = vcombine.high %v199_v29, %v203_v30 }
  0xdc   :  { %1382 = vmatpush1.bf16.msra.mxu0 %v3585_v39  ;;  %v211_v39 = vld [vmem:[#allocation5 + $0x2f8] sm:$0xff] }
  0xdd   :  { %3634 = vmatmul.mubr.msk.bf16.vlgmr.msra.gmra.mrb[8].mxu1 %vm1158_vm1, %v4596_v2  ;;  %2828 = vmatprep.subr.bf16.mxu0 %v4046_v41  ;;  %v4073_v41 = vld [vmem:[#allocation8 + $0xd8] ss:$12 sps:$4 sm:$0xff]   ;;  %v3556_v44 = vcombine.high %v207_v37, %v211_v39 }
  0xde   :  { %1434 = vmatpush1.bf16.msra.mxu1 %v3467_v42  ;;  %1465 = vmatprep.mubr.bf16.mxu1 %v4591_v56  ;;  %v3491_v56 = vcombine.low %v143_v48, %v147_v49  ;;  %v3547_v42 = vcombine.low %v199_v29, %v203_v30  ;;  %v4085_v48 = vld [vmem:[#allocation8 + $0x10c] ss:$12 sps:$4 sm:$0xff]   ;;  %v283_v29 = vld [vmem:[#allocation5 + $0x538] sm:$0x33] }
  0xdf   :  { %1435 = vmatprep.subr.bf16.mxu1 %v3476_v40  ;;  %1384 = vmatmul.mubr.bf16.vlgmr.msra.gmra.mrb[4].mxu0 %v4603_v34  ;;  %v215_v40 = vld [vmem:[#allocation5 + $0x318] sm:$0xff] }
  0xe0   :  { %2829 = vmatpush1.bf16.msra.mxu0 %v4044_v45  ;;  %v219_v45 = vld [vmem:[#allocation5 + $0x338] sm:$0xff] }
  0xe1   :  { %2830 = vmatprep.subr.bf16.mxu0 %v4049_v46  ;;  %v4078_v46 = vld [vmem:[#allocation8 + $0xf0] ss:$12 sps:$4 sm:$0xff]   ;;  %v3564_v49 = vcombine.high %v215_v40, %v219_v45 }
  0xe2   :  { %1436 = vmatpush1.bf16.msra.mxu1 %v3475_v47  ;;  %v3555_v47 = vcombine.low %v207_v37, %v211_v39  ;;  %v4081_v37 = vld [vmem:[#allocation8 + $0xf8] ss:$12 sps:$4 sm:$0xff]   ;;  %v4086_v39 = vld [vmem:[#allocation8 + $0x110] ss:$12 sps:$4 sm:$0xff]  }
  0xe3   :  { %1437 = vmatprep.subr.bf16.mxu1 %v3484_v50  ;;  %v223_v50 = vld [vmem:[#allocation5 + $0x358] sm:$0xff] }
  0xe4   :  { %2831 = vmatpush1.bf16.msra.mxu0 %v4047_v51  ;;  %v227_v51 = vld [vmem:[#allocation5 + $0x378] sm:$0xff] }
  0xe5   :  { %2832 = vmatprep.subr.bf16.mxu0 %v4052_v52  ;;  %v4083_v52 = vld [vmem:[#allocation8 + $0x108] ss:$12 sps:$4 sm:$0xff]   ;;  %v3572_v55 = vcombine.high %v223_v50, %v227_v51 }
  0xe6   :  { %1438 = vmatpush1.bf16.msra.mxu1 %v3483_v53  ;;  %v3563_v53 = vcombine.low %v215_v40, %v219_v45  ;;  %v4097_v40 = vld [vmem:[#allocation8 + $0x80] ss:$12 sps:$4 sm:$0xff]   ;;  %v4102_v45 = vld [vmem:[#allocation8 + $0x98] ss:$12 sps:$4 sm:$0xff]  }
  0xe7   :  { %1439 = vmatprep.subr.bf16.mxu1 %v3492_v57  ;;  %v231_v57 = vld [vmem:[#allocation5 + $0x398] sm:$0xff] }
  0xe8   :  { %2833 = vmatpush1.bf16.msra.mxu0 %v4050_v58  ;;  %v235_v58 = vld [vmem:[#allocation5 + $0x3b8] sm:$0xff] }
  0xe9   :  { %2834 = vmatprep.subr.bf16.mxu0 %v4055_v59  ;;  %v4088_v59 = vld [vmem:[#allocation8 + $0x120] ss:$12 sps:$4 sm:$0xff]   ;;  %v3580_v61 = vcombine.high %v231_v57, %v235_v58 }
  0xea   :  { %1440 = vmatpush1.bf16.msra.mxu1 %v3491_v56  ;;  %v3571_v56 = vcombine.low %v223_v50, %v227_v51  ;;  %v4107_v50 = vld [vmem:[#allocation8 + $0xb0] ss:$12 sps:$4 sm:$0xff]  }
  0xeb   :  { %1441 = vmatprep.subr.bf16.mxu1 %v3500_v62  ;;  %v239_v62 = vld [vmem:[#allocation5 + $0x3d8] sm:$0xff] }
  0xec   :  { %2835 = vmatpush1.bf16.msra.mxu0 %v4053_v63  ;;  %v243_v63 = vld [vmem:[#allocation5 + $0x3f8] sm:$0xff] }
  0xed   :  { %2836 = vmatprep.subr.bf16.mxu0 %v4058_v1  ;;  %v4093_v1 = vld [vmem:[#allocation8 + $0x138] ss:$12 sps:$4 sm:$0xff]   ;;  %v3588_v5 = vcombine.high %v239_v62, %v243_v63 }
  0xee   :  { %1442 = vmatpush1.bf16.msra.mxu1 %v3499_v3  ;;  %v3579_v3 = vcombine.low %v231_v57, %v235_v58 }
  0xef   :  { %1443 = vmatprep.subr.bf16.mxu1 %v3508_v7  ;;  %v247_v7 = vld [vmem:[#allocation5 + $0x418] sm:$0xff] }
  0xf0   :  { %2837 = vmatpush1.bf16.msra.mxu0 %v4056_v8  ;;  %v251_v8 = vld [vmem:[#allocation5 + $0x438] sm:$0xff] }
  0xf1   :  { %2838 = vmatprep.subr.bf16.mxu0 %v4061_v9  ;;  %v4098_v9 = vld [vmem:[#allocation8 + $0x150] ss:$12 sps:$4 sm:$0xff]   ;;  %v3596_v12 = vcombine.high %v247_v7, %v251_v8  ;;  %v3595_v16 = vcombine.low %v247_v7, %v251_v8  ;;  %v4108_v8 = vld [vmem:[#allocation8 + $0x180] ss:$12 sps:$4 sm:$0xff]  }
  0xf2   :  { %1444 = vmatpush1.bf16.msra.mxu1 %v3507_v10  ;;  %v3587_v10 = vcombine.low %v239_v62, %v243_v63 }
  0xf3   :  { %1445 = vmatprep.subr.bf16.mxu1 %v3516_v13  ;;  %v255_v13 = vld [vmem:[#allocation5 + $0x458] sm:$0xff] }
  0xf4   :  { %2839 = vmatpush1.bf16.msra.mxu0 %v4059_v14  ;;  %v259_v14 = vld [vmem:[#allocation5 + $0x478] sm:$0xff] }
  0xf5   :  { %2840 = vmatprep.subr.bf16.mxu0 %v4064_v17  ;;  %v3604_v17 = vcombine.high %v255_v13, %v259_v14 }
  0xf6   :  { %1446 = vmatpush1.bf16.msra.mxu1 %v3515_v15  ;;  %v4103_v15 = vld [vmem:[#allocation8 + $0x168] ss:$12 sps:$4 sm:$0xff]  }
  0xf7   :  { %1447 = vmatprep.subr.bf16.mxu1 %v3524_v18  ;;  %v4110_v18 = vld [vmem:[#allocation8 + $0x184] ss:$12 sps:$4 sm:$0xff]  }
  0xf8   :  { %2841 = vmatpush1.bf16.msra.mxu0 %v4062_v20  ;;  %v267_v20 = vld [vmem:[#allocation5 + $0x4b8] sm:$0xff] }
  0xf9   :  { %2842 = vmatprep.subr.bf16.mxu0 %v4067_v23  ;;  %v3612_v22 = vcombine.high %v263_v19, %v267_v20  ;;  %v271_v23 = vld [vmem:[#allocation5 + $0x4d8] sm:$0xff]  ;;  %v3611_v26 = vcombine.low %v263_v19, %v267_v20  ;;  %v4123_v19 = vld [vmem:[#allocation8 + $0x1cc] ss:$12 sps:$4 sm:$0xff]  }
  0xfa   :  { %1448 = vmatpush1.bf16.msra.mxu1 %v3523_v21  ;;  %v3603_v21 = vcombine.low %v255_v13, %v259_v14  ;;  %v4111_v13 = vld [vmem:[#allocation8 + $0x198] ss:$12 sps:$4 sm:$0xff]   ;;  %v4120_v14 = vld [vmem:[#allocation8 + $0x1a0] ss:$12 sps:$4 sm:$0xff]   ;;  %v4129_v20 = vld [vmem:[#allocation8 + $0x290] ss:$12 sps:$4 sm:$0xff]  }
  0xfb   :  { %1449 = vmatprep.subr.bf16.mxu1 %v3532_v25  ;;  %v275_v25 = vld [vmem:[#allocation5 + $0x4f8] sm:$0xff] }
  0xfc   :  { %2843 = vmatpush1.bf16.msra.mxu0 %v4065_v27  ;;  %v3620_v27 = vcombine.high %v271_v23, %v275_v25  ;;  %v3619_v30 = vcombine.low %v271_v23, %v275_v25  ;;  %v4128_v23 = vld [vmem:[#allocation8 + $0x1e4] ss:$12 sps:$4 sm:$0xff]   ;;  %v4134_v25 = vld [vmem:[#allocation8 + $0x2a8] ss:$12 sps:$4 sm:$0xff]  }
  0xfd   :  { %2844 = vmatprep.subr.bf16.mxu0 %v4070_v31 }
  0xfe   :  { %1450 = vmatpush1.bf16.msra.mxu1 %v3531_v28  ;;  %v279_v28 = vld [vmem:[#allocation5 + $0x518] sm:$0xff] }
  0xff   :  { %1451 = vmatprep.subr.bf16.mxu1 %v3540_v32  ;;  %v3627_v31 = vcombine.low %v279_v28, %v283_v29  ;;  %v4071_v32 = vld [vmem:[#allocation8 + $0xc8] ss:$12 sps:$4 sm:$0xff]  }
 0x100   :  { %2845 = vmatpush1.bf16.msra.mxu0 %v4068_v33  ;;  %v4072_v33 = vld [vmem:[#allocation8 + $0x8] ss:$12 sps:$4 sm:$0xff]  }
 0x101   :  { %2846 = vmatprep.subr.bf16.mxu0 %v4075_v35  ;;  %v4076_v35 = vld [vmem:[#allocation8 + $0xe0] ss:$12 sps:$4 sm:$0xff]  }
 0x102   :  { %1452 = vmatpush1.bf16.msra.mxu1 %v3539_v36  ;;  %v4077_v36 = vld [vmem:[#allocation8 + $0x20] ss:$12 sps:$4 sm:$0xff]  }
 0x103   :  { %1453 = vmatprep.subr.bf16.mxu1 %v3548_v38  ;;  %v4082_v38 = vld [vmem:[#allocation8 + $0x38] ss:$12 sps:$4 sm:$0xff]  }
 0x104   :  { %2847 = vmatpush1.bf16.msra.mxu0 %v4073_v41  ;;  %v4087_v41 = vld [vmem:[#allocation8 + $0x50] ss:$12 sps:$4 sm:$0xff]  }
 0x105   :  { %2848 = vmatprep.subr.bf16.mxu0 %v4080_v43  ;;  %v4092_v43 = vld [vmem:[#allocation8 + $0x68] ss:$12 sps:$4 sm:$0xff]  }
 0x106   :  { %1454 = vmatpush1.bf16.msra.mxu1 %v3547_v42  ;;  %v4091_v42 = vld [vmem:[#allocation8 + $0x128] ss:$12 sps:$4 sm:$0xff]  }
 0x107   :  { %1455 = vmatprep.subr.bf16.mxu1 %v3556_v44  ;;  %v4096_v44 = vld [vmem:[#allocation8 + $0x140] ss:$12 sps:$4 sm:$0xff]  }
 0x108   :  { %2849 = vmatpush1.bf16.msra.mxu0 %v4078_v46  ;;  %v4106_v46 = vld [vmem:[#allocation8 + $0x170] ss:$12 sps:$4 sm:$0xff]  }
 0x109   :  { %2850 = vmatprep.subr.bf16.mxu0 %v4085_v48 }
 0x10a   :  { %1456 = vmatpush1.bf16.msra.mxu1 %v3555_v47 }
 0x10b   :  { %1457 = vmatprep.subr.bf16.mxu1 %v3564_v49 }
 0x10c   :  { %2851 = vmatpush1.bf16.msra.mxu0 %v4083_v52  ;;  %v4114_v52 = vld [vmem:[#allocation8 + $0x248] ss:$12 sps:$4 sm:$0xff]  }
 0x10d   :  { %2852 = vmatprep.subr.bf16.mxu0 %v4090_v54  ;;  %v4627_v54 = vld [vmem:[#allocation7] sm:$0xff] }
 0x10e   :  { %1458 = vmatpush1.bf16.msra.mxu1 %v3563_v53  ;;  %v288_v53 = vsub.s32 0, %v4584_v24 }
 0x10f   :  { %1459 = vmatprep.subr.bf16.mxu1 %v3572_v55  ;;  %v292_v55 = vsub.s32 1, %v4584_v24 }
 0x110   :  { %2853 = vmatpush1.bf16.msra.mxu0 %v4088_v59  ;;  %v289_v57 = vrot.slane %v4627_v54, %v288_v53 }
 0x111   :  { %2854 = vmatprep.subr.bf16.mxu0 %v4095_v60  ;;  %v293_v58 = vrot.slane %v4627_v54, %v292_v55 }
 0x112   :  { %1460 = vmatpush1.bf16.msra.mxu1 %v3571_v56 }
 0x113   :  { %1461 = vmatprep.subr.bf16.mxu1 %v3580_v61 }
 0x114   :  { %2855 = vmatpush1.bf16.msra.mxu0 %v4093_v1 }
 0x115   :  { %2856 = vmatprep.subr.bf16.mxu0 %v4100_v4 }
 0x116   :  { %1462 = vmatpush1.bf16.msra.mxu1 %v3579_v3 }
 0x117   :  { %1463 = vmatprep.subr.bf16.mxu1 %v3588_v5 }
 0x118   :  { %2857 = vmatpush1.bf16.msra.mxu0 %v4098_v9  ;;  %v4115_v9 = vld [vmem:[#allocation8 + $0x188] ss:$12 sps:$4 sm:$0xff]  }
 0x119   :  { %2858 = vmatprep.subr.bf16.mxu0 %v4105_v11  ;;  %v4113_v11 = vld [vmem:[#allocation8 + $0x19c] ss:$12 sps:$4 sm:$0xff]  }
 0x11a   :  { %1464 = vmatpush1.bf16.msra.mxu1 %v3587_v10 }
 0x11b   :  { %1474 = vmatprep.subr.bf16.mxu1 %v3596_v12  ;;  %v4119_v12 = vld [vmem:[#allocation8 + $0x260] ss:$12 sps:$4 sm:$0xff]  }
 0x11c   :  { %2859 = vmatpush1.bf16.msra.mxu0 %v4103_v15  ;;  %v4118_v15 = vld [vmem:[#allocation8 + $0x1b4] ss:$12 sps:$4 sm:$0xff]  }
 0x11d   :  { %1466 = vmatmul.mubr.bf16.vlgmr.msra.gmra.mrb[12].mxu1 %v4603_v34  ;;  %2869 = vmatprep.subr.bf16.mxu0 %v4110_v18  ;;  %v3628_v34 = vcombine.high %v279_v28, %v283_v29  ;;  %v4125_v18 = vld [vmem:[#allocation8 + $0x1b8] ss:$12 sps:$4 sm:$0xff]   ;;  %v4133_v28 = vld [vmem:[#allocation8 + $0x1fc] ss:$12 sps:$4 sm:$0xff]   ;;  %v4139_v29 = vld [vmem:[#allocation8 + $0x2c0] ss:$12 sps:$4 sm:$0xff]  }
 0x11e   :  { %1475 = vmatpush1.bf16.msra.mxu1 %v3595_v16  ;;  %1506 = vmatprep.mubr.bf16.mxu1 %v4477_v0  ;;  %v1182_v0 = vsel %vm1162_vm0, %v3627_v31, 0  ;;  %v4124_v16 = vld [vmem:[#allocation8 + $0x278] ss:$12 sps:$4 sm:$0xff]   ;;  %v4138_v31 = vld [vmem:[#allocation8 + $0x214] ss:$12 sps:$4 sm:$0xff]  }
 0x11f   :  { %1476 = vmatprep.subr.bf16.mxu1 %v3604_v17  ;;  %v4116_v17 = vld [vmem:[#allocation8 + $0x1b0] ss:$12 sps:$4 sm:$0xff]  }
 0x122   :  { %1477 = vmatpush1.bf16.msra.mxu1 %v3603_v21  ;;  %v4121_v21 = vld [vmem:[#allocation8 + $0x1c8] ss:$12 sps:$4 sm:$0xff]  }
 0x123   :  { %1478 = vmatprep.subr.bf16.mxu1 %v3612_v22  ;;  %v4130_v22 = vld [vmem:[#allocation8 + $0x1d0] ss:$12 sps:$4 sm:$0xff]  }
 0x126   :  { %1479 = vmatpush1.bf16.msra.mxu1 %v3611_v26  ;;  %v4126_v26 = vld [vmem:[#allocation8 + $0x1e0] ss:$12 sps:$4 sm:$0xff]  }
 0x127   :  { %1480 = vmatprep.subr.bf16.mxu1 %v3620_v27  ;;  %v4135_v27 = vld [vmem:[#allocation8 + $0x1e8] ss:$12 sps:$4 sm:$0xff]  }
 0x12a   :  { %1481 = vmatpush1.bf16.msra.mxu1 %v3619_v30  ;;  %v4131_v30 = vld [vmem:[#allocation8 + $0x1f8] ss:$12 sps:$4 sm:$0xff]  }
 0x12b   :  { %3635 = vmatprep.subr.msk.bf16.mxu1 %vm1162_vm0, %v3628_v34  ;;  %v4140_v34 = vld [vmem:[#allocation8 + $0x200] ss:$12 sps:$4 sm:$0xff]  }
 0x12e   :  { %1483 = vmatpush1.bf16.msra.mxu1 %v1182_v0  ;;  %v4144_v0 = vld [vmem:[#allocation8 + $0x2d8] ss:$12 sps:$4 sm:$0xff]  }
 0x12f   :  { %3854 = vmatprep.subr.bf16.mxu1 %v4071_v32  ;;  %v4136_v32 = vld [vmem:[#allocation8 + $0x210] ss:$12 sps:$4 sm:$0xff]  }
 0x131   :  { %3636 = vmatmul.mubr.msk.bf16.vlgmr.msra.gmra.mrb[12].mxu1 %vm1158_vm1, %v4596_v2  ;;  %v4101_v2 = vld [vmem:[#allocation8 + $0x158] ss:$12 sps:$4 sm:$0xff]  }
 0x132   :  { %3855 = vmatpush3.bf16.msra.mxu1 %v4072_v33  ;;  %v4145_v33 = vld [vmem:[#allocation8 + $0x218] ss:$12 sps:$4 sm:$0xff]  }
 0x133   :  { %3856 = vmatprep.subr.bf16.mxu1 %v4076_v35  ;;  %v4143_v35 = vld [vmem:[#allocation8 + $0x22c] ss:$12 sps:$4 sm:$0xff]  }
 0x136   :  { %3857 = vmatpush3.bf16.msra.mxu1 %v4077_v36  ;;  %v4149_v36 = vld [vmem:[#allocation8 + $0x2f0] ss:$12 sps:$4 sm:$0xff]  }
 0x137   :  { %3858 = vmatprep.subr.bf16.mxu1 %v4081_v37  ;;  %v296_v37 = vsub.s32 2, %v4584_v24 }
 0x13a   :  { %3859 = vmatpush3.bf16.msra.mxu1 %v4082_v38  ;;  %v300_v38 = vsub.s32 3, %v4584_v24 }
 0x13b   :  { %3860 = vmatprep.subr.bf16.mxu1 %v4086_v39  ;;  %v4141_v39 = vld [vmem:[#allocation8 + $0x228] ss:$12 sps:$4 sm:$0xff]  }
 0x13e   :  { %3861 = vmatpush3.bf16.msra.mxu1 %v4087_v41  ;;  %v4150_v41 = vld [vmem:[#allocation8 + $0x230] ss:$12 sps:$4 sm:$0xff]  }
 0x13f   :  { %3862 = vmatprep.subr.bf16.mxu1 %v4091_v42  ;;  %v4148_v42 = vld [vmem:[#allocation8 + $0x244] ss:$12 sps:$4 sm:$0xff]  }
 0x142   :  { %3863 = vmatpush3.bf16.msra.mxu1 %v4092_v43  ;;  %v4154_v43 = vld [vmem:[#allocation8 + $0x3c8] ss:$12 sps:$4 sm:$0xff]  }
 0x143   :  { %3864 = vmatprep.subr.bf16.mxu1 %v4096_v44  ;;  %v297_v44 = vrot.slane %v4627_v54, %v296_v37 }
 0x146   :  { %3865 = vmatpush3.bf16.msra.mxu1 %v4097_v40  ;;  %v301_v40 = vrot.slane %v4627_v54, %v300_v38 }
 0x147   :  { %3866 = vmatprep.subr.bf16.mxu1 %v4101_v2  ;;  %v4146_v2 = vld [vmem:[#allocation8 + $0x240] ss:$12 sps:$4 sm:$0xff]  }
 0x148   :  { %v1262_v47 = vpop.f32.mrb[0].mxu1 }
 0x149   :  { %v1264_v48 = vpop.f32.mrb[1].mxu1 }
 0x14a   :  { %v1266_v49 = vpop.f32.mrb[2].mxu1  ;;  %3867 = vmatpush3.bf16.msra.mxu1 %v4102_v45 }
 0x14b   :  { %v1267_v51 = vpop.f32.mrb[3].mxu1  ;;  %3868 = vmatprep.subr.bf16.mxu1 %v4106_v46  ;;  %v4153_v46 = vld [vmem:[#allocation8 + $0x25c] ss:$12 sps:$4 sm:$0xff]  }
 0x14e   :  { %3869 = vmatpush3.bf16.msra.mxu1 %v4107_v50 }
 0x14f   :  { %3876 = vmatprep.subr.bf16.mxu1 %v4114_v52  ;;  %v4151_v52 = vld [vmem:[#allocation8 + $0x258] ss:$12 sps:$4 sm:$0xff]  }
 0x172   :  { %v1221_v59 = vpop.f32.mrb[0].mxu0 }
 0x173   :  { %v1222_v56 = vadd.f32 %v1221_v59, %v289_v57  ;;  %v1223_v60 = vpop.f32.mrb[1].mxu0  ;;  %v4158_v59 = vld [vmem:[#allocation8 + $0x274] ss:$12 sps:$4 sm:$0xff]  }
 0x174   :  { %v1224_v61 = vadd.f32 %v1223_v60, %v293_v58  ;;  %v1225_v62 = vpop.f32.mrb[2].mxu0 }
 0x175   :  { %v1263_v63 = vadd.f32 %v1262_v47, %v1222_v56  ;;  %v1226_v1 = vpop.f32.mrb[3].mxu0  ;;  %v4156_v62 = vld [vmem:[#allocation8 + $0x270] ss:$12 sps:$4 sm:$0xff]  }
 0x176   :  { %v1265_v3 = vadd.f32 %v1264_v48, %v1224_v61  ;;  %v4155_v61 = vld [vmem:[#allocation8 + $0x308] ss:$12 sps:$4 sm:$0xff]   ;;  %v4163_v1 = vld [vmem:[#allocation8 + $0x28c] ss:$12 sps:$4 sm:$0xff]  }
 0x177   :  { %v1515_v4 = vmax.f32 %v1263_v63, 0.0  ;;  %v4159_v63 = vld [vmem:[#allocation8 + $0x3e0] ss:$12 sps:$4 sm:$0xff]  }
 0x178   :  { %v1516_v5 = vmax.f32 %v1265_v3, 0.0  ;;  %v4160_v3 = vld [vmem:[#allocation8 + $0x320] ss:$12 sps:$4 sm:$0xff]  }
 0x179   :  { %v1523_v10 = vpack.c.bf16 %v1515_v4, %v1515_v4  ;;  %v4161_v4 = vld [vmem:[#allocation8 + $0x288] ss:$12 sps:$4 sm:$0xff]  }
 0x17a   :  { %v1524_v7 = vpack.c.bf16 %v1516_v5, %v1516_v5  ;;  %v4164_v5 = vld [vmem:[#allocation8 + $0x3f8] ss:$12 sps:$4 sm:$0xff]  }
 0x17c   :  { %2860 = vmatprep.mubr.bf16.mxu0 %v1524_v7  ;;  %3024 = vmatprep.mubr.bf16.mxu1 %v1524_v7  ;;  %v4168_v7 = vld [vmem:[#allocation8 + $0x2a4] ss:$12 sps:$4 sm:$0xff]  }
 0x17d   :  { %2861 = vmatmul.mubr.bf16.vlgmr.msra.gmra.mrb[8].mxu0 %v1523_v10  ;;  %3025 = vmatmul.mubr.bf16.vlgmr.msra.gmra.mrb[16].mxu1 %v1523_v10  ;;  %v4169_v10 = vld [vmem:[#allocation8 + $0x410] ss:$12 sps:$4 sm:$0xff]  }
 0x17e   :  { %2870 = vmatpush1.bf16.msra.mxu0 %v4108_v8  ;;  %3877 = vmatpush3.bf16.msra.mxu1 %v4115_v9  ;;  %v4165_v8 = vld [vmem:[#allocation8 + $0x338] ss:$12 sps:$4 sm:$0xff]   ;;  %v4166_v9 = vld [vmem:[#allocation8 + $0x2a0] ss:$12 sps:$4 sm:$0xff]  }
 0x17f   :  { %2871 = vmatprep.subr.bf16.mxu0 %v4113_v11  ;;  %3878 = vmatprep.subr.bf16.mxu1 %v4119_v12  ;;  %v4173_v11 = vld [vmem:[#allocation8 + $0x2bc] ss:$12 sps:$4 sm:$0xff]   ;;  %v304_v12 = vsub.s32 4, %v4584_v24 }
 0x182   :  { %2872 = vmatpush1.bf16.msra.mxu0 %v4111_v13  ;;  %3879 = vmatpush3.bf16.msra.mxu1 %v4120_v14  ;;  %v308_v13 = vsub.s32 5, %v4584_v24  ;;  %v4170_v14 = vld [vmem:[#allocation8 + $0x350] ss:$12 sps:$4 sm:$0xff]  }
 0x183   :  { %2873 = vmatprep.subr.bf16.mxu0 %v4118_v15  ;;  %3880 = vmatprep.subr.bf16.mxu1 %v4124_v16  ;;  %v4171_v15 = vld [vmem:[#allocation8 + $0x2b8] ss:$12 sps:$4 sm:$0xff]   ;;  %v4174_v16 = vld [vmem:[#allocation8 + $0x428] ss:$12 sps:$4 sm:$0xff]  }
 0x186   :  { %2874 = vmatpush1.bf16.msra.mxu0 %v4116_v17  ;;  %3881 = vmatpush3.bf16.msra.mxu1 %v4125_v18  ;;  %v4178_v17 = vld [vmem:[#allocation8 + $0x2d4] ss:$12 sps:$4 sm:$0xff]   ;;  %v305_v18 = vrot.slane %v4627_v54, %v304_v12 }
 0x187   :  { %2875 = vmatprep.subr.bf16.mxu0 %v4123_v19  ;;  %3882 = vmatprep.subr.bf16.mxu1 %v4129_v20  ;;  %v309_v20 = vrot.slane %v4627_v54, %v308_v13  ;;  %v4249_v12 = vld [vmem:[#allocation8 + $0x5c0] ss:$12 sps:$4 sm:$0xff]  }
 0x188   :  { %v4211_v13 = vld [vmem:[#allocation8 + $0x3ac] ss:$12 sps:$4 sm:$0xff]  }
 0x18a   :  { %2876 = vmatpush1.bf16.msra.mxu0 %v4121_v21  ;;  %3883 = vmatpush3.bf16.msra.mxu1 %v4130_v22  ;;  %v4175_v22 = vld [vmem:[#allocation8 + $0x368] ss:$12 sps:$4 sm:$0xff]  }
 0x18b   :  { %2877 = vmatprep.subr.bf16.mxu0 %v4128_v23  ;;  %3884 = vmatprep.subr.bf16.mxu1 %v4134_v25  ;;  %v4176_v25 = vld [vmem:[#allocation8 + $0x2d0] ss:$12 sps:$4 sm:$0xff]  }
 0x18e   :  { %2878 = vmatpush1.bf16.msra.mxu0 %v4126_v26  ;;  %3885 = vmatpush3.bf16.msra.mxu1 %v4135_v27  ;;  %v4179_v26 = vld [vmem:[#allocation8 + $0x440] ss:$12 sps:$4 sm:$0xff]  }
 0x18f   :  { %2879 = vmatprep.subr.bf16.mxu0 %v4133_v28  ;;  %3886 = vmatprep.subr.bf16.mxu1 %v4139_v29 }
 0x192   :  { %2880 = vmatpush1.bf16.msra.mxu0 %v4131_v30  ;;  %3887 = vmatpush3.bf16.msra.mxu1 %v4140_v34  ;;  %v4183_v34 = vld [vmem:[#allocation8 + $0x2ec] ss:$12 sps:$4 sm:$0xff]  }
 0x193   :  { %2881 = vmatprep.subr.bf16.mxu0 %v4138_v31  ;;  %3888 = vmatprep.subr.bf16.mxu1 %v4144_v0 }
 0x196   :  { %2882 = vmatpush1.bf16.msra.mxu0 %v4136_v32  ;;  %3889 = vmatpush3.bf16.msra.mxu1 %v4145_v33  ;;  %v4180_v32 = vld [vmem:[#allocation8 + $0x380] ss:$12 sps:$4 sm:$0xff]  }
 0x197   :  { %2883 = vmatprep.subr.bf16.mxu0 %v4143_v35  ;;  %3890 = vmatprep.subr.bf16.mxu1 %v4149_v36  ;;  %v4181_v36 = vld [vmem:[#allocation8 + $0x2e8] ss:$12 sps:$4 sm:$0xff]  }
 0x19a   :  { %2884 = vmatpush1.bf16.msra.mxu0 %v4141_v39  ;;  %3891 = vmatpush3.bf16.msra.mxu1 %v4150_v41  ;;  %v4184_v39 = vld [vmem:[#allocation8 + $0x458] ss:$12 sps:$4 sm:$0xff]  }
 0x19b   :  { %2885 = vmatprep.subr.bf16.mxu0 %v4148_v42  ;;  %3898 = vmatprep.subr.bf16.mxu1 %v4154_v43  ;;  %v4188_v41 = vld [vmem:[#allocation8 + $0x304] ss:$12 sps:$4 sm:$0xff]  }
 0x19c   :  { %v1344_v45 = vpop.f32.mrb[4].mxu1  ;;  %v4185_v43 = vld [vmem:[#allocation8 + $0x398] ss:$12 sps:$4 sm:$0xff]  }
 0x19d   :  { %v3997_v47 = vadd.f32 %v1344_v45, %v297_v44  ;;  %v1346_v48 = vpop.f32.mrb[5].mxu1  ;;  %v4193_v45 = vld [vmem:[#allocation8 + $0x31c] ss:$12 sps:$4 sm:$0xff]  }
 0x19e   :  { %v3998_v49 = vadd.f32 %v1346_v48, %v301_v40  ;;  %v1348_v50 = vpop.f32.mrb[6].mxu1  ;;  %2886 = vmatpush1.bf16.msra.mxu0 %v4146_v2  ;;  %v4186_v40 = vld [vmem:[#allocation8 + $0x300] ss:$12 sps:$4 sm:$0xff]   ;;  %v4189_v2 = vld [vmem:[#allocation8 + $0x470] ss:$12 sps:$4 sm:$0xff]  }
 0x19f   :  { %v1517_v51 = vmax.f32 %v3997_v47, 0.0  ;;  %v1349_v57 = vpop.f32.mrb[7].mxu1  ;;  %2887 = vmatprep.subr.bf16.mxu0 %v4153_v46  ;;  %v4190_v47 = vld [vmem:[#allocation8 + $0x3b0] ss:$12 sps:$4 sm:$0xff]   ;;  %v4191_v48 = vld [vmem:[#allocation8 + $0x318] ss:$12 sps:$4 sm:$0xff]  }
 0x1a0   :  { %v1518_v58 = vmax.f32 %v3998_v49, 0.0  ;;  %v4224_v49 = vld [vmem:[#allocation8 + $0x548] ss:$12 sps:$4 sm:$0xff]   ;;  %v4194_v57 = vld [vmem:[#allocation8 + $0x330] ss:$12 sps:$4 sm:$0xff]  }
 0x1a1   :  { %v4642_v56 = vpack.c.bf16 %v1517_v51, %v1517_v51  ;;  %v4196_v50 = vld [vmem:[#allocation8 + $0x334] ss:$12 sps:$4 sm:$0xff]  }
 0x1a2   :  { %v1526_v60 = vpack.c.bf16 %v1518_v58, %v1518_v58  ;;  %2888 = vmatpush1.bf16.msra.mxu0 %v4151_v52  ;;  %v4228_v52 = vld [vmem:[#allocation8 + $0x488] ss:$12 sps:$4 sm:$0xff]   ;;  %v4229_v58 = vld [vmem:[#allocation8 + $0x560] ss:$12 sps:$4 sm:$0xff]  }
 0x1a3   :  { %2889 = vmatprep.subr.bf16.mxu0 %v4158_v59  ;;  %v4199_v59 = vld [vmem:[#allocation8 + $0x34c] ss:$12 sps:$4 sm:$0xff]  }
 0x1a4   :  { %3064 = vmatprep.mubr.bf16.mxu1 %v1526_v60  ;;  %2901 = vmatprep.mubr.bf16.mxu0 %v1526_v60  ;;  %v4197_v60 = vld [vmem:[#allocation8 + $0x348] ss:$12 sps:$4 sm:$0xff]  }
 0x1a5   :  { %3065 = vmatmul.mubr.bf16.vlgmr.msra.gmra.mrb[20].mxu1 %v4642_v56 }
 0x1a6   :  { %3899 = vmatpush3.bf16.msra.mxu1 %v4155_v61  ;;  %2890 = vmatpush1.bf16.msra.mxu0 %v4156_v62  ;;  %v4234_v61 = vld [vmem:[#allocation8 + $0x578] ss:$12 sps:$4 sm:$0xff]  }
 0x1a7   :  { %3900 = vmatprep.subr.bf16.mxu1 %v4159_v63  ;;  %2891 = vmatprep.subr.bf16.mxu0 %v4163_v1  ;;  %v4202_v62 = vld [vmem:[#allocation8 + $0x364] ss:$12 sps:$4 sm:$0xff]   ;;  %v4200_v1 = vld [vmem:[#allocation8 + $0x360] ss:$12 sps:$4 sm:$0xff]  }
 0x1a8   :  { %v4238_v63 = vld [vmem:[#allocation8 + $0x4b8] ss:$12 sps:$4 sm:$0xff]  }
 0x1aa   :  { %3901 = vmatpush3.bf16.msra.mxu1 %v4160_v3  ;;  %2892 = vmatpush1.bf16.msra.mxu0 %v4161_v4  ;;  %v4239_v3 = vld [vmem:[#allocation8 + $0x590] ss:$12 sps:$4 sm:$0xff]  }
 0x1ab   :  { %3902 = vmatprep.subr.bf16.mxu1 %v4164_v5  ;;  %2893 = vmatprep.subr.bf16.mxu0 %v4168_v7  ;;  %v4205_v4 = vld [vmem:[#allocation8 + $0x37c] ss:$12 sps:$4 sm:$0xff]   ;;  %v4203_v7 = vld [vmem:[#allocation8 + $0x378] ss:$12 sps:$4 sm:$0xff]  }
 0x1ac   :  { %v4243_v5 = vld [vmem:[#allocation8 + $0x4d0] ss:$12 sps:$4 sm:$0xff]  }
 0x1ae   :  { %3903 = vmatpush3.bf16.msra.mxu1 %v4165_v8  ;;  %2894 = vmatpush1.bf16.msra.mxu0 %v4166_v9  ;;  %v4244_v8 = vld [vmem:[#allocation8 + $0x5a8] ss:$12 sps:$4 sm:$0xff]  }
 0x1af   :  { %3904 = vmatprep.subr.bf16.mxu1 %v4169_v10  ;;  %2895 = vmatprep.subr.bf16.mxu0 %v4173_v11  ;;  %v4208_v9 = vld [vmem:[#allocation8 + $0x394] ss:$12 sps:$4 sm:$0xff]   ;;  %v4206_v11 = vld [vmem:[#allocation8 + $0x390] ss:$12 sps:$4 sm:$0xff]  }
 0x1b0   :  { %v1426_v19 = vpop.f32.mrb[8].mxu1  ;;  %v4248_v10 = vld [vmem:[#allocation8 + $0x4e8] ss:$12 sps:$4 sm:$0xff]  }
 0x1b1   :  { %v1428_v21 = vpop.f32.mrb[9].mxu1 }
 0x1b2   :  { %3905 = vmatpush3.bf16.msra.mxu1 %v4170_v14  ;;  %v1430_v23 = vpop.f32.mrb[10].mxu1  ;;  %2896 = vmatpush1.bf16.msra.mxu0 %v4171_v15  ;;  %v1385_v27 = vpop.f32.mrb[4].mxu0  ;;  %v4253_v14 = vld [vmem:[#allocation8 + $0x500] ss:$12 sps:$4 sm:$0xff]   ;;  %v4209_v15 = vld [vmem:[#allocation8 + $0x3a8] ss:$12 sps:$4 sm:$0xff]  }
 0x1b3   :  { %3906 = vmatprep.subr.bf16.mxu1 %v4174_v16  ;;  %v1431_v28 = vpop.f32.mrb[11].mxu1  ;;  %2897 = vmatprep.subr.bf16.mxu0 %v4178_v17  ;;  %v1386_v29 = vadd.f32 %v1385_v27, %v305_v18  ;;  %v1387_v30 = vpop.f32.mrb[5].mxu0  ;;  %v4254_v16 = vld [vmem:[#allocation8 + $0x5d8] ss:$12 sps:$4 sm:$0xff]  }
 0x1b4   :  { %v1388_v31 = vadd.f32 %v1387_v30, %v309_v20  ;;  %v1389_v0 = vpop.f32.mrb[6].mxu0  ;;  %v4214_v17 = vld [vmem:[#allocation8 + $0x3c4] ss:$12 sps:$4 sm:$0xff]   ;;  %v4223_v27 = vld [vmem:[#allocation8 + $0x40c] ss:$12 sps:$4 sm:$0xff]  }
 0x1b5   :  { %v1427_v33 = vadd.f32 %v1426_v19, %v1386_v29  ;;  %v1390_v35 = vpop.f32.mrb[7].mxu0  ;;  %v4258_v18 = vld [vmem:[#allocation8 + $0x518] ss:$12 sps:$4 sm:$0xff]   ;;  %v4212_v19 = vld [vmem:[#allocation8 + $0x3c0] ss:$12 sps:$4 sm:$0xff]  }
 0x1b6   :  { %3907 = vmatpush3.bf16.msra.mxu1 %v4175_v22  ;;  %2898 = vmatpush1.bf16.msra.mxu0 %v4176_v25  ;;  %v1429_v38 = vadd.f32 %v1428_v21, %v1388_v31  ;;  %v4259_v20 = vld [vmem:[#allocation8 + $0x5f0] ss:$12 sps:$4 sm:$0xff]   ;;  %v4215_v23 = vld [vmem:[#allocation8 + $0x3d8] ss:$12 sps:$4 sm:$0xff]   ;;  %v4220_v25 = vld [vmem:[#allocation8 + $0x3f4] ss:$12 sps:$4 sm:$0xff]  }
 0x1b7   :  { %3908 = vmatprep.subr.bf16.mxu1 %v4179_v26  ;;  %2899 = vmatprep.subr.bf16.mxu0 %v4183_v34  ;;  %v1519_v46 = vmax.f32 %v1427_v33, 0.0  ;;  %v4217_v21 = vld [vmem:[#allocation8 + $0x3dc] ss:$12 sps:$4 sm:$0xff]   ;;  %v4227_v29 = vld [vmem:[#allocation8 + $0x424] ss:$12 sps:$4 sm:$0xff]  }
 0x1b8   :  { %v1520_v42 = vmax.f32 %v1429_v38, 0.0  ;;  %v4263_v22 = vld [vmem:[#allocation8 + $0x530] ss:$12 sps:$4 sm:$0xff]   ;;  %v4221_v28 = vld [vmem:[#allocation8 + $0x408] ss:$12 sps:$4 sm:$0xff]  }
 0x1b9   :  { %v4650_v51 = vpack.c.bf16 %v1519_v46, %v1519_v46  ;;  %v4218_v26 = vld [vmem:[#allocation8 + $0x3f0] ss:$12 sps:$4 sm:$0xff]   ;;  %v4225_v30 = vld [vmem:[#allocation8 + $0x420] ss:$12 sps:$4 sm:$0xff]   ;;  %v4230_v31 = vld [vmem:[#allocation8 + $0x438] ss:$12 sps:$4 sm:$0xff]  }
 0x1ba   :  { %3909 = vmatpush3.bf16.msra.mxu1 %v4180_v32  ;;  %2900 = vmatpush1.bf16.msra.mxu0 %v4181_v36  ;;  %v1528_v44 = vpack.c.bf16 %v1520_v42, %v1520_v42  ;;  %v4232_v34 = vld [vmem:[#allocation8 + $0x43c] ss:$12 sps:$4 sm:$0xff]   ;;  %v4237_v0 = vld [vmem:[#allocation8 + $0x454] ss:$12 sps:$4 sm:$0xff]   ;;  %v4242_v33 = vld [vmem:[#allocation8 + $0x46c] ss:$12 sps:$4 sm:$0xff]  }
 0x1bb   :  { %3910 = vmatprep.subr.bf16.mxu1 %v4184_v39  ;;  %2910 = vmatprep.subr.bf16.mxu0 %v4188_v41  ;;  %v4235_v32 = vld [vmem:[#allocation8 + $0x450] ss:$12 sps:$4 sm:$0xff]   ;;  %v4240_v35 = vld [vmem:[#allocation8 + $0x468] ss:$12 sps:$4 sm:$0xff]   ;;  %v4245_v38 = vld [vmem:[#allocation8 + $0x480] ss:$12 sps:$4 sm:$0xff]  }
 0x1bc   :  { %3104 = vmatprep.mubr.bf16.mxu1 %v1528_v44  ;;  %v4247_v36 = vld [vmem:[#allocation8 + $0x484] ss:$12 sps:$4 sm:$0xff]   ;;  %v4252_v39 = vld [vmem:[#allocation8 + $0x49c] ss:$12 sps:$4 sm:$0xff]   ;;  %v312_v41 = vsub.s32 6, %v4584_v24  ;;  %v316_v42 = vsub.s32 7, %v4584_v24 }
 0x1bd   :  { %2902 = vmatmul.mubr.bf16.vlgmr.msra.gmra.mrb[8].mxu0 %v4642_v56  ;;  %v4233_v56 = vld [vmem:[#allocation8 + $0x4a0] ss:$12 sps:$4 sm:$0xff]   ;;  %v4318_v24 = vld [vmem:[#allocation10 + $0x90] sm:$0xff]  }
 0x1be   :  { %3911 = vmatpush3.bf16.msra.mxu1 %v4185_v43  ;;  %2911 = vmatpush1.bf16.msra.mxu0 %v4186_v40  ;;  %v4250_v43 = vld [vmem:[#allocation8 + $0x498] ss:$12 sps:$4 sm:$0xff]   ;;  %v313_v40 = vrot.slane %v4627_v54, %v312_v41 }
 0x1bf   :  { %3912 = vmatprep.subr.bf16.mxu1 %v4189_v2  ;;  %2912 = vmatprep.subr.bf16.mxu0 %v4193_v45  ;;  %v317_v2 = vrot.slane %v4627_v54, %v316_v42  ;;  %v4255_v45 = vld [vmem:[#allocation8 + $0x4b0] ss:$12 sps:$4 sm:$0xff]   ;;  %v4264_v54 = vld [vmem:[#allocation8 + $0x4e0] ss:$12 sps:$4 sm:$0xff]  }
 0x1c0   :  { %2942 = vmatprep.mubr.bf16.mxu0 %v1528_v44  ;;  %v4257_v44 = vld [vmem:[#allocation8 + $0x4b4] ss:$12 sps:$4 sm:$0xff]  }
 0x1c1   :  { %v4309_v41 = vld [vmem:[#allocation10 + $0x20] sm:$0xff]  }
 0x1c2   :  { %3913 = vmatpush3.bf16.msra.mxu1 %v4190_v47  ;;  %2913 = vmatpush1.bf16.msra.mxu0 %v4191_v48  ;;  %v4262_v47 = vld [vmem:[#allocation8 + $0x4cc] ss:$12 sps:$4 sm:$0xff]  }
 0x1c3   :  { %3920 = vmatprep.subr.bf16.mxu1 %v4224_v49  ;;  %2914 = vmatprep.subr.bf16.mxu0 %v4196_v50 }
 0x1c5   :  { %3105 = vmatmul.mubr.bf16.vlgmr.msra.gmra.mrb[24].mxu1 %v4650_v51 }
 0x1c6   :  { %3921 = vmatpush3.bf16.msra.mxu1 %v4228_v52  ;;  %2915 = vmatpush1.bf16.msra.mxu0 %v4194_v57  ;;  %v4260_v57 = vld [vmem:[#allocation8 + $0x4c8] ss:$12 sps:$4 sm:$0xff]  }
 0x1c7   :  { %3922 = vmatprep.subr.bf16.mxu1 %v4229_v58  ;;  %2916 = vmatprep.subr.bf16.mxu0 %v4199_v59 }
 0x1ca   :  { %3923 = vmatpush3.bf16.msra.mxu1 %v4233_v56  ;;  %2917 = vmatpush1.bf16.msra.mxu0 %v4197_v60  ;;  %v4266_v56 = vld [vmem:[#allocation8 + $0x4e4] ss:$12 sps:$4 sm:$0xff]  }
 0x1cb   :  { %3924 = vmatprep.subr.bf16.mxu1 %v4234_v61  ;;  %2918 = vmatprep.subr.bf16.mxu0 %v4202_v62  ;;  %v4269_v62 = vld [vmem:[#allocation8 + $0x4fc] ss:$12 sps:$4 sm:$0xff]  }
 0x1ce   :  { %3925 = vmatpush3.bf16.msra.mxu1 %v4238_v63  ;;  %2919 = vmatpush1.bf16.msra.mxu0 %v4200_v1  ;;  %v4267_v63 = vld [vmem:[#allocation8 + $0x4f8] ss:$12 sps:$4 sm:$0xff]   ;;  %v4272_v1 = vld [vmem:[#allocation8 + $0x514] ss:$12 sps:$4 sm:$0xff]  }
 0x1cf   :  { %3926 = vmatprep.subr.bf16.mxu1 %v4239_v3  ;;  %2920 = vmatprep.subr.bf16.mxu0 %v4205_v4  ;;  %v4270_v3 = vld [vmem:[#allocation8 + $0x510] ss:$12 sps:$4 sm:$0xff]   ;;  %v4275_v4 = vld [vmem:[#allocation8 + $0x52c] ss:$12 sps:$4 sm:$0xff]  }
 0x1d2   :  { %3927 = vmatpush3.bf16.msra.mxu1 %v4243_v5  ;;  %2921 = vmatpush1.bf16.msra.mxu0 %v4203_v7  ;;  %v4273_v5 = vld [vmem:[#allocation8 + $0x528] ss:$12 sps:$4 sm:$0xff]   ;;  %v4278_v7 = vld [vmem:[#allocation8 + $0x544] ss:$12 sps:$4 sm:$0xff]  }
 0x1d3   :  { %3928 = vmatprep.subr.bf16.mxu1 %v4244_v8  ;;  %2922 = vmatprep.subr.bf16.mxu0 %v4208_v9  ;;  %v4276_v8 = vld [vmem:[#allocation8 + $0x540] ss:$12 sps:$4 sm:$0xff]   ;;  %v4281_v9 = vld [vmem:[#allocation8 + $0x55c] ss:$12 sps:$4 sm:$0xff]  }
 0x1d6   :  { %3929 = vmatpush3.bf16.msra.mxu1 %v4248_v10  ;;  %2923 = vmatpush1.bf16.msra.mxu0 %v4206_v11  ;;  %v4279_v10 = vld [vmem:[#allocation8 + $0x558] ss:$12 sps:$4 sm:$0xff]   ;;  %v4284_v11 = vld [vmem:[#allocation8 + $0x574] ss:$12 sps:$4 sm:$0xff]  }
 0x1d7   :  { %3930 = vmatprep.subr.bf16.mxu1 %v4249_v12  ;;  %2924 = vmatprep.subr.bf16.mxu0 %v4211_v13  ;;  %v4282_v12 = vld [vmem:[#allocation8 + $0x570] ss:$12 sps:$4 sm:$0xff]   ;;  %v4287_v13 = vld [vmem:[#allocation8 + $0x58c] ss:$12 sps:$4 sm:$0xff]  }
 0x1da   :  { %3931 = vmatpush3.bf16.msra.mxu1 %v4253_v14  ;;  %2925 = vmatpush1.bf16.msra.mxu0 %v4209_v15  ;;  %v4285_v14 = vld [vmem:[#allocation8 + $0x588] ss:$12 sps:$4 sm:$0xff]   ;;  %v4290_v15 = vld [vmem:[#allocation8 + $0x5a4] ss:$12 sps:$4 sm:$0xff]  }
 0x1db   :  { %3932 = vmatprep.subr.bf16.mxu1 %v4254_v16  ;;  %2926 = vmatprep.subr.bf16.mxu0 %v4214_v17  ;;  %v4288_v16 = vld [vmem:[#allocation8 + $0x5a0] ss:$12 sps:$4 sm:$0xff]   ;;  %v4293_v17 = vld [vmem:[#allocation8 + $0x5bc] ss:$12 sps:$4 sm:$0xff]  }
 0x1de   :  { %3933 = vmatpush3.bf16.msra.mxu1 %v4258_v18  ;;  %2927 = vmatpush1.bf16.msra.mxu0 %v4212_v19  ;;  %v4291_v18 = vld [vmem:[#allocation8 + $0x5b8] ss:$12 sps:$4 sm:$0xff]   ;;  %v4296_v19 = vld [vmem:[#allocation8 + $0x5d4] ss:$12 sps:$4 sm:$0xff]  }
 0x1df   :  { %3934 = vmatprep.subr.bf16.mxu1 %v4259_v20  ;;  %2928 = vmatprep.subr.bf16.mxu0 %v4217_v21  ;;  %v4294_v20 = vld [vmem:[#allocation8 + $0x5d0] ss:$12 sps:$4 sm:$0xff]   ;;  %v4299_v21 = vld [vmem:[#allocation8 + $0x5ec] ss:$12 sps:$4 sm:$0xff]  }
 0x1e2   :  { %3935 = vmatpush3.bf16.msra.mxu1 %v4263_v22  ;;  %2929 = vmatpush1.bf16.msra.mxu0 %v4215_v23  ;;  %v4297_v22 = vld [vmem:[#allocation8 + $0x5e8] ss:$12 sps:$4 sm:$0xff]  }
 0x1e3   :  { %2930 = vmatprep.subr.bf16.mxu0 %v4220_v25 }
 0x1e6   :  { %2931 = vmatpush1.bf16.msra.mxu0 %v4218_v26 }
 0x1e7   :  { %2932 = vmatprep.subr.bf16.mxu0 %v4223_v27 }
 0x1ea   :  { %2933 = vmatpush1.bf16.msra.mxu0 %v4221_v28 }
 0x1eb   :  { %2934 = vmatprep.subr.bf16.mxu0 %v4227_v29  ;;  %v4300_v29 = vld [vmem:[#allocation10 + $0x40] sm:$0xff]  }
 0x1ec   :  { %3942 = vmatprep.subr.bf16.mxu1 %v4300_v29 }
 0x1ee   :  { %2935 = vmatpush1.bf16.msra.mxu0 %v4225_v30  ;;  %v4301_v30 = vld [vmem:[#allocation10] sm:$0xff]  }
 0x1ef   :  { %2936 = vmatprep.subr.bf16.mxu0 %v4232_v34  ;;  %v4302_v34 = vld [vmem:[#allocation10 + $0x48] sm:$0xff]  }
 0x1f2   :  { %2937 = vmatpush1.bf16.msra.mxu0 %v4230_v31  ;;  %v4303_v31 = vld [vmem:[#allocation10 + $0x8] sm:$0xff]  }
 0x1f3   :  { %2938 = vmatprep.subr.bf16.mxu0 %v4237_v0  ;;  %v4304_v0 = vld [vmem:[#allocation10 + $0x50] sm:$0xff]  }
 0x1f6   :  { %2939 = vmatpush1.bf16.msra.mxu0 %v4235_v32  ;;  %v4305_v32 = vld [vmem:[#allocation10 + $0x10] sm:$0xff]  }
 0x1f7   :  { %2940 = vmatprep.subr.bf16.mxu0 %v4242_v33  ;;  %v4306_v33 = vld [vmem:[#allocation10 + $0x58] sm:$0xff]  }
 0x1fa   :  { %2941 = vmatpush1.bf16.msra.mxu0 %v4240_v35  ;;  %v1787_v35 = vld [vmem:[%s4687_s4] sm:$0x7] }
 0x1fb   :  { %2951 = vmatprep.subr.bf16.mxu0 %v4247_v36  ;;  %v4307_v36 = vld [vmem:[#allocation10 + $0x18] sm:$0xff]  }
 0x1fd   :  { %2943 = vmatmul.mubr.bf16.vlgmr.msra.gmra.mrb[8].mxu0 %v4650_v51 }
 0x1fe   :  { %2952 = vmatpush1.bf16.msra.mxu0 %v4245_v38  ;;  %v4308_v38 = vld [vmem:[#allocation10 + $0x60] sm:$0xff]  }
 0x1ff   :  { %2953 = vmatprep.subr.bf16.mxu0 %v4252_v39  ;;  %v1800_v39 = vrot.slane %v1787_v35, %v296_v37  ;;  %v4314_v37 = vld [vmem:[#allocation10 + $0x78] sm:$0xff]  }
 0x202   :  { %2954 = vmatpush1.bf16.msra.mxu0 %v4250_v43  ;;  %v4310_v43 = vld [vmem:[#allocation10 + $0x68] sm:$0xff]  }
 0x203   :  { %2955 = vmatprep.subr.bf16.mxu0 %v4257_v44 }
 0x204   :  { %v1508_v46 = vpop.f32.mrb[12].mxu1 }
 0x205   :  { %v4003_v48 = vadd.f32 %v1508_v46, %v313_v40  ;;  %v1510_v49 = vpop.f32.mrb[13].mxu1 }
 0x206   :  { %v4004_v50 = vadd.f32 %v1510_v49, %v317_v2  ;;  %v1512_v52 = vpop.f32.mrb[14].mxu1  ;;  %2956 = vmatpush1.bf16.msra.mxu0 %v4255_v45  ;;  %v4312_v49 = vld [vmem:[#allocation10 + $0x70] sm:$0xff]  }
 0x207   :  { %v1521_v51 = vmax.f32 %v4003_v48, 0.0  ;;  %v1513_v58 = vpop.f32.mrb[15].mxu1  ;;  %2957 = vmatprep.subr.bf16.mxu0 %v4262_v47  ;;  %v4311_v47 = vld [vmem:[#allocation10 + $0x28] sm:$0xff]   ;;  %v4315_v52 = vld [vmem:[#allocation10 + $0x38] sm:$0xff]  }
 0x208   :  { %v1522_v59 = vmax.f32 %v4004_v50, 0.0  ;;  %v4313_v50 = vld [vmem:[#allocation10 + $0x30] sm:$0xff]  }
 0x209   :  { %v1529_v60 = vpack.c.bf16 %v1521_v51, %v1521_v51 }
 0x20a   :  { %v1530_v61 = vpack.c.bf16 %v1522_v59, %v1522_v59  ;;  %2958 = vmatpush1.bf16.msra.mxu0 %v4260_v57 }
 0x20b   :  { %2959 = vmatprep.subr.bf16.mxu0 %v4266_v56  ;;  %v4479_v56 = vmov 0.0  }
 0x20c   :  { %3144 = vmatprep.mubr.bf16.mxu1 %v1530_v61  ;;  %2983 = vmatprep.mubr.bf16.mxu0 %v1530_v61 }
 0x20d   :  { %3145 = vmatmul.mubr.bf16.vlgmr.msra.gmra.mrb[28].mxu1 %v1529_v60 }
 0x20e   :  { %2960 = vmatpush1.bf16.msra.mxu0 %v4264_v54  ;;  %3943 = vmatpush3.bf16.msra.mxu1 %v4301_v30 }
 0x20f   :  { %2961 = vmatprep.subr.bf16.mxu0 %v4269_v62  ;;  %3944 = vmatprep.subr.bf16.mxu1 %v4302_v34  ;;  %v3829_v34 = vld [vmem:[%s4689_s6] ss:$0 sm:$0xff] }
 0x212   :  { %2962 = vmatpush1.bf16.msra.mxu0 %v4267_v63  ;;  %3945 = vmatpush3.bf16.msra.mxu1 %v4303_v31 }
 0x213   :  { %2963 = vmatprep.subr.bf16.mxu0 %v4272_v1  ;;  %3946 = vmatprep.subr.bf16.mxu1 %v4304_v0 }
 0x216   :  { %2964 = vmatpush1.bf16.msra.mxu0 %v4270_v3  ;;  %3947 = vmatpush3.bf16.msra.mxu1 %v4305_v32 }
 0x217   :  { %2965 = vmatprep.subr.bf16.mxu0 %v4275_v4  ;;  %3948 = vmatprep.subr.bf16.mxu1 %v4306_v33 }
 0x21a   :  { %2966 = vmatpush1.bf16.msra.mxu0 %v4273_v5  ;;  %3949 = vmatpush3.bf16.msra.mxu1 %v4307_v36  ;;  %v1792_v5 = vrot.slane %v1787_v35, %v288_v53  ;;  %v4319_v53 = vld [vmem:[#allocation10 + $0x98] sm:$0xff]  }
 0x21b   :  { %2967 = vmatprep.subr.bf16.mxu0 %v4278_v7  ;;  %3950 = vmatprep.subr.bf16.mxu1 %v4308_v38  ;;  %v1796_v7 = vrot.slane %v1787_v35, %v292_v55  ;;  %v4320_v55 = vld [vmem:[#allocation10 + $0xa0] sm:$0xff]   ;;  %v3438_v38 = vand.u32 127, %v98_v6 }
 0x21d   :  { %vm3439_vm3 = vcmp.lt.s32.totalorder %v3438_v38, 100 }
 0x21e   :  { %2968 = vmatpush1.bf16.msra.mxu0 %v4276_v8  ;;  %3951 = vmatpush3.bf16.msra.mxu1 %v4309_v41 }
 0x21f   :  { %2969 = vmatprep.subr.bf16.mxu0 %v4281_v9  ;;  %3952 = vmatprep.subr.bf16.mxu1 %v4310_v43 }
 0x222   :  { %2970 = vmatpush1.bf16.msra.mxu0 %v4279_v10  ;;  %3953 = vmatpush3.bf16.msra.mxu1 %v4311_v47 }
 0x223   :  { %2971 = vmatprep.subr.bf16.mxu0 %v4284_v11  ;;  %3954 = vmatprep.subr.bf16.mxu1 %v4312_v49 }
 0x226   :  { %2972 = vmatpush1.bf16.msra.mxu0 %v4282_v12  ;;  %3955 = vmatpush3.bf16.msra.mxu1 %v4313_v50 }
 0x227   :  { %2973 = vmatprep.subr.bf16.mxu0 %v4287_v13  ;;  %3956 = vmatprep.subr.bf16.mxu1 %v4314_v37 }
 0x22a   :  { %2974 = vmatpush1.bf16.msra.mxu0 %v4285_v14  ;;  %3957 = vmatpush3.bf16.msra.mxu1 %v4315_v52 }
 0x22b   :  { %2975 = vmatprep.subr.bf16.mxu0 %v4290_v15  ;;  %3973 = vmatprep.subr.bf16.mxu1 %v4479_v56 }
 0x22e   :  { %2976 = vmatpush1.bf16.msra.mxu0 %v4288_v16 }
 0x22f   :  { %2977 = vmatprep.subr.bf16.mxu0 %v4293_v17  ;;  %v4316_v17 = vld [vmem:[#allocation10 + $0x80] sm:$0xff]  }
 0x232   :  { %2978 = vmatpush1.bf16.msra.mxu0 %v4291_v18 }
 0x233   :  { %2979 = vmatprep.subr.bf16.mxu0 %v4296_v19  ;;  %v4317_v19 = vld [vmem:[#allocation10 + $0x88] sm:$0xff]  }
 0x236   :  { %2980 = vmatpush1.bf16.msra.mxu0 %v4294_v20  ;;  %v4321_v20 = vld [vmem:[#allocation10 + $0xa8] sm:$0xff]  }
 0x237   :  { %2981 = vmatprep.subr.bf16.mxu0 %v4299_v21  ;;  %v4322_v21 = vld [vmem:[#allocation10 + $0xb0] sm:$0xff]  }
 0x23a   :  { %2982 = vmatpush1.bf16.msra.mxu0 %v4297_v22  ;;  %v4323_v22 = vld [vmem:[#allocation10 + $0xb8] sm:$0xff]  }
 0x23d   :  { %2984 = vmatmul.mubr.bf16.vlgmr.msra.gmra.mrb[8].mxu0 %v1529_v60 }
 0x250   :  { %v3870_v23 = vpop.f32.mrb[16].mxu1 }
 0x251   :  { %v3871_v25 = vpop.f32.mrb[17].mxu1 }
 0x252   :  { %v3872_v26 = vadd.f32 %v3871_v25, %v3870_v23  ;;  %v3873_v27 = vpop.f32.mrb[18].mxu1 }
 0x253   :  { %v3874_v28 = vpop.f32.mrb[19].mxu1 }
 0x254   :  { %v3027_v40 = vadd.f32 %v3872_v26, %v1800_v39 }
 0x278   :  { %v3892_v42 = vpop.f32.mrb[20].mxu1 }
 0x279   :  { %v3893_v44 = vpop.f32.mrb[21].mxu1 }
 0x27a   :  { %v3894_v2 = vadd.f32 %v3893_v44, %v3892_v42  ;;  %v3895_v45 = vpop.f32.mrb[22].mxu1 }
 0x27b   :  { %v3896_v46 = vpop.f32.mrb[23].mxu1 }
 0x27c   :  { %v3067_v48 = vadd.f32 %v3894_v2, %v3027_v40 }
 0x298   :  { %v3914_v51 = vpop.f32.mrb[24].mxu1 }
 0x299   :  { %v3915_v57 = vpop.f32.mrb[25].mxu1 }
 0x29a   :  { %v3916_v58 = vadd.f32 %v3915_v57, %v3914_v51  ;;  %v3917_v59 = vpop.f32.mrb[26].mxu1 }
 0x29b   :  { %v3918_v60 = vpop.f32.mrb[27].mxu1 }
 0x29c   :  { %v3107_v61 = vadd.f32 %v3916_v58, %v3067_v48 }
 0x2e0   :  { %v3936_v54 = vpop.f32.mrb[28].mxu1 }
 0x2e1   :  { %v3937_v62 = vpop.f32.mrb[29].mxu1 }
 0x2e2   :  { %v3938_v63 = vadd.f32 %v3937_v62, %v3936_v54  ;;  %v3939_v1 = vpop.f32.mrb[30].mxu1 }
 0x2e3   :  { %v3940_v3 = vpop.f32.mrb[31].mxu1 }
 0x2e4   :  { %v3147_v4 = vadd.f32 %v3938_v63, %v3107_v61 }
 0x2e6   :  { %v3154_v23 = vmax.f32 %v3147_v4, 0.0 }
 0x2e8   :  { %v3157_v25 = vpack.c.bf16 %v3154_v23, %v3154_v23 }
 0x310   :  { %v2985_v8 = vpop.f32.mrb[8].mxu0 }
 0x311   :  { %v4005_v9 = vadd.f32 %v2985_v8, %v1792_v5  ;;  %v2987_v10 = vpop.f32.mrb[9].mxu0 }
 0x312   :  { %v4006_v11 = vadd.f32 %v2987_v10, %v1796_v7  ;;  %v2989_v12 = vpop.f32.mrb[10].mxu0 }
 0x313   :  { %v3152_v13 = vmax.f32 %v4005_v9, 0.0  ;;  %v2990_v14 = vpop.f32.mrb[11].mxu0 }
 0x314   :  { %v3153_v15 = vmax.f32 %v4006_v11, 0.0 }
 0x315   :  { %v3155_v18 = vpack.c.bf16 %v3152_v13, %v3152_v13 }
 0x316   :  { %v3156_v16 = vpack.c.bf16 %v3153_v15, %v3153_v15 }
 0x318   :  { %3389 = vmatprep.mubr.bf16.mxu1 %v3156_v16 }
 0x319   :  { %3390 = vmatmul.mubr.bf16.vlgmr.msra.gmra.mrb[32].mxu1 %v3155_v18 }
 0x31a   :  { %3974 = vmatpush3.bf16.msra.mxu1 %v4316_v17  ;;  %3989 = vmatprep.mubr.msk.bf16.mxu1 %vm4480_vm2, %v4479_v56 }
 0x31b   :  { %3975 = vmatprep.subr.bf16.mxu1 %v4479_v56 }
 0x31e   :  { %3976 = vmatpush3.bf16.msra.mxu1 %v4317_v19 }
 0x31f   :  { %3977 = vmatprep.subr.bf16.mxu1 %v4479_v56 }
 0x322   :  { %3978 = vmatpush3.bf16.msra.mxu1 %v4318_v24 }
 0x323   :  { %3979 = vmatprep.subr.bf16.mxu1 %v4479_v56 }
 0x326   :  { %3980 = vmatpush3.bf16.msra.mxu1 %v4319_v53 }
 0x327   :  { %3981 = vmatprep.subr.bf16.mxu1 %v4479_v56 }
 0x32a   :  { %3982 = vmatpush3.bf16.msra.mxu1 %v4320_v55 }
 0x32b   :  { %3983 = vmatprep.subr.bf16.mxu1 %v4479_v56 }
 0x32e   :  { %3984 = vmatpush3.bf16.msra.mxu1 %v4321_v20 }
 0x32f   :  { %3985 = vmatprep.subr.bf16.mxu1 %v4479_v56 }
 0x332   :  { %3986 = vmatpush3.bf16.msra.mxu1 %v4322_v21 }
 0x333   :  { %3987 = vmatprep.subr.bf16.mxu1 %v4479_v56 }
 0x336   :  { %3988 = vmatpush3.bf16.msra.mxu1 %v4323_v22 }
 0x339   :  { %3990 = vmatmul.mubr.bf16.vlgmr.msra.gmra.mrb[36].mxu1 %v3157_v25 }
 0x3ec   :  { %v3958_v26 = vpop.f32.mrb[32].mxu1 }
 0x3ed   :  { %v3959_v27 = vpop.f32.mrb[33].mxu1 }
 0x3ee   :  { %v3960_v28 = vadd.f32 %v3959_v27, %v3958_v26  ;;  %v3961_v29 = vpop.f32.mrb[34].mxu1 }
 0x3ef   :  { %v3962_v30 = vpop.f32.mrb[35].mxu1 }
 0x3f0   :  { %v3392_v31 = vadd.f32 %v3960_v28, %v3829_v34 }
 0x40c   :  { %v3431_v0 = vpop.f32.mrb[36].mxu1 }
 0x40d   :  { %v3432_v32 = vadd.f32 %v3431_v0, %v3392_v31  ;;  %v3991_v33 = vpop.f32.mrb[37].mxu1 }
 0x40e   :  { %v3434_v35 = vpop.f32.mrb[38].mxu1 }
 0x40f   :  { %4324 = vtanh.f32 %v3432_v32  ;;  %v3992_v36 = vpop.f32.mrb[39].mxu1  ;;  %v3440_v39 = vmax.f32 %v3432_v32, 0.0 }
 0x419   :  { %v4325_v41 = vpop.eup %4324 }
 0x41a   :  { %v3442_v42 = vsel %vm3439_vm3, %v3440_v39, %v4325_v41 }
 0x41b   :  { %3443 = vst [vmem:[#allocation11] sm:$0x3] %v3442_v42 }
 0x41c   :  { %4447 = shalt.err (!%p4444_p2)
}
 0x41d   :  { %s4448_s21 = scalar_lea.hbm %s4690_s7, 32 }
 0x41e   :  { %p4449_p3 = scmp.ne.s32.totalorder %s4690_s7, %s4448_s21  ;;  %p4452_p4 = scmp.lt.u32.totalorder %s4448_s21, %s4690_s7 }
 0x420   :  { %p4454_p5 = pnand %p4452_p4, %p4449_p3 }
 0x422   :  { %4457 = shalt.err (!%p4454_p5)
}
 0x423   :  { %3453 = dma.vmem_to_hbm [thread:$0]  %s3451_s18, 32, %s4690_s7, [#allocation4]  }
 0x424   :  { %4464 = dma.done.wait [#allocation4], 32  }
 0x425   :  { %4465 = vsyncadd [#allocation4], 4294967264 }
 0x426   :  { %3457 = vsyncpa [#allocation3], 1 }
 0x427   :  { %3458 = vsyncpa [#allocation6], 1 }
 0x428   :  { %3459 = vsyncpa [#allocation9], 1 }
 0x429   :  { %3460 = vsyncpa [#allocation4], 1 }

</bundles_post_ra>
